<compile_context>
chip_gen: v6e
topology: v6e:2x2x1
jax: 0.10.0
libtpu: 0.0.40
codegen_flags: <defaults>
</compile_context>

<pallas_src>
import numpy as np
from math import exp

import jax
import jax.numpy as jnp
from jax.experimental import pallas as pl
from jax.experimental.pallas import tpu as pltpu

WINDOW_SIZE = 11
SIGMA = 1.5
C1 = 0.01 ** 2
C2 = 0.03 ** 2


def _gaussian_1d(window_size=WINDOW_SIZE, sigma=SIGMA):
    # Deterministic init mirroring gaussian(window_size, 1.5).
    g = np.array(
        [exp(-((x - window_size // 2) ** 2) / float(2 * sigma ** 2))
         for x in range(window_size)],
        dtype=np.float32,
    )
    return g / g.sum()


_G1D = _gaussian_1d()
_WINDOW = np.outer(_G1D, _G1D).astype(np.float32)   # (11, 11), reference only


def _same_conv_band_matrix(n, window_size=WINDOW_SIZE):
    """(n, n) matrix A with (x @ A)[:, j] == zero-padded 'same' Gaussian blur."""
    pad = window_size // 2
    m = np.zeros((n, n), dtype=np.float32)
    for j in range(n):
        for b in range(window_size):
            k = j + b - pad
            if 0 <= k < n:
                m[k, j] = _G1D[b]
    return m


def _block_diag(a, copies):
    n = a.shape[0]
    out = np.zeros((n * copies, n * copies), dtype=np.float32)
    for l in range(copies):
        out[l * n:(l + 1) * n, l * n:(l + 1) * n] = a
    return out


def _vmem_limit_bytes():
    """Generation-aware VMEM limit (~80% of physical; 64 MiB fallback)."""
    cap = 64 << 20
    try:
        cap = int(pltpu.get_tpu_info().vmem_capacity_bytes)
    except Exception:
        pass
    return max(32 << 20, min(int(cap * 0.8), cap - (4 << 20)))


def _choose_bands_per_block(n_bands, Hpp, N, vmem_limit):
    # Per-block working-set estimate (f32): 2 pipelined inputs (x2 buffers),
    # 5-map stacked source scratch + fused lane-pass result, 5 blurred maps
    # and a few elementwise temporaries ~= 18 slabs of (P_sub*Hpp, N) plus the
    # (N, N) band matrix double-buffered.  Target ~60% of the VMEM limit so
    # the compiler keeps headroom for its own temporaries.
    budget = int(vmem_limit * 0.6)
    fixed = 8 * N * N
    per_band = 18 * 4 * Hpp * N
    p = (budget - fixed) // max(per_band, 1)
    p = int(max(1, min(p, n_bands, 256)))
    if n_bands >= 2:
        # Keep >= 2 grid steps so the "parallel" axis can shard across both
        # TensorCores on v7x (negligible cost on single-core generations).
        p = min(p, -(-n_bands // 2))
    return p


def _make_ssim_kernel(P_sub, Hpp, H, N, window_size=WINDOW_SIZE):
    ws = window_size
    g = [float(v) for v in _G1D]
    M = P_sub * Hpp               # rows of one source map inside a block
    R = M - (ws - 1)              # rows produced by the sublane (H) pass

    def kernel(x1_ref, x2_ref, a_ref, mask_ref, out_ref, src_ref):
        x1 = x1_ref[...]          # (M, N): P_sub sublane bands, lane-packed W
        x2 = x2_ref[...]

        # Hoisted products, stacked along sublanes in a persistent VMEM
        # scratch -> ONE fused MXU matmul does the lane (W) Gaussian pass for
        # all five maps of all bands in this block.
        src_ref[0 * M:1 * M, :] = x1
        src_ref[1 * M:2 * M, :] = x2
        src_ref[2 * M:3 * M, :] = x1 * x1
        src_ref[3 * M:4 * M, :] = x2 * x2
        src_ref[4 * M:5 * M, :] = x1 * x2

        col = jnp.dot(src_ref[...], a_ref[...],
                      preferred_element_type=jnp.float32)       # (5M, N)

        # Sublane (H) Gaussian pass: 11-tap shift-and-accumulate (VPU) per
        # stacked map; zero-pad rows are baked into the band layout so edges
        # get the exact zero-padded 'same' conv semantics.
        def row_blur(y):
            acc = g[0] * y[0:R, :]
            for dy in range(1, ws):
                acc = acc + g[dy] * y[dy:dy + R, :]
            return acc

        mu1 = row_blur(col[0 * M:1 * M, :])
        mu2 = row_blur(col[1 * M:2 * M, :])
        e11 = row_blur(col[2 * M:3 * M, :])
        e22 = row_blur(col[3 * M:4 * M, :])
        e12 = row_blur(col[4 * M:5 * M, :])

        mu1_sq = mu1 * mu1
        mu2_sq = mu2 * mu2
        mu1_mu2 = mu1 * mu2
        sigma1_sq = e11 - mu1_sq
        sigma2_sq = e22 - mu2_sq
        sigma12 = e12 - mu1_mu2

        ssim_map = ((2.0 * mu1_mu2 + C1) * (2.0 * sigma12 + C2)) / (
            (mu1_sq + mu2_sq + C1) * (sigma1_sq + sigma2_sq + C2))

        # Single masked reduction; mask zeroes conv-tail / alignment rows of
        # every plane band (rows i with (i mod Hpp) >= H).
        total = jnp.sum(ssim_map * mask_ref[...], keepdims=True)   # (1, 1)
        out_ref[...] = total[None]                                 # (1, 1, 1)

    return kernel


def ssim_pallas(img1, img2, window_size=WINDOW_SIZE):
    """SSIM(img1, img2) with size_average=True; inputs are NCHW float32."""
    B, C, H, W = img1.shape
    pad = window_size // 2
    n_planes = B * C

    # Lane packing: L planes side by side along the 128-lane axis when W is
    # small; the block-diagonal band matrix keeps lane groups independent.
    L = max(1, min(128 // W, n_planes)) if W < 128 else 1
    N = L * W

    Hpp = ((H + 2 * pad + 7) // 8) * 8       # band height: H conv pad + align
    n_bands = -(-n_planes // L)              # sublane bands needed overall

    vmem_limit = _vmem_limit_bytes()
    P_sub = _choose_bands_per_block(n_bands, Hpp, N, vmem_limit)
    num_blocks = -(-n_bands // P_sub)
    n_total = num_blocks * P_sub * L
    n_pad_planes = n_total - n_planes        # zero planes -> SSIM == 1 / pixel

    M = P_sub * Hpp
    R = M - (window_size - 1)

    def prep(x):
        x = x.reshape(n_planes, H, W).astype(jnp.float32)
        x = jnp.pad(x, ((0, n_pad_planes), (0, 0), (0, 0)))
        x = x.reshape(num_blocks, P_sub, L, H, W)
        x = jnp.pad(x, ((0, 0), (0, 0), (0, 0),
                        (pad, Hpp - H - pad), (0, 0)))
        x = jnp.transpose(x, (0, 1, 3, 2, 4))   # (blocks, P_sub, Hpp, L, W)
        return x.reshape(num_blocks * M, N)

    x1 = prep(img1)
    x2 = prep(img2)
    awt = jnp.asarray(_block_diag(_same_conv_band_matrix(W, window_size), L))
    row_mask = jnp.asarray(
        ((np.arange(R) % Hpp) < H).astype(np.float32).reshape(R, 1))

    kernel = _make_ssim_kernel(P_sub, Hpp, H, N, window_size)
    partials = pl.pallas_call(
        kernel,
        out_shape=jax.ShapeDtypeStruct((num_blocks, 1, 1), jnp.float32),
        grid_spec=pltpu.PrefetchScalarGridSpec(
            num_scalar_prefetch=0,
            grid=(num_blocks,),
            in_specs=[
                pl.BlockSpec((M, N), lambda i: (i, 0)),
                pl.BlockSpec((M, N), lambda i: (i, 0)),
                pl.BlockSpec((N, N), lambda i: (0, 0)),
                pl.BlockSpec((R, 1), lambda i: (0, 0)),
            ],
            out_specs=pl.BlockSpec((1, 1, 1), lambda i: (i, 0, 0)),
            scratch_shapes=[pltpu.VMEM((5 * M, N), jnp.float32)],
        ),
        compiler_params=pltpu.CompilerParams(
            dimension_semantics=("parallel",),
            vmem_limit_bytes=int(vmem_limit)),
    )(x1, x2, awt, row_mask)

    # Padded zero planes contribute exactly 1.0 per valid pixel; remove them,
    # then take the global mean (size_average=True).
    total = jnp.sum(partials) - jnp.float32(n_pad_planes * H * W)
    return total / jnp.float32(n_planes * H * W)


def ssim_reference(img1, img2, window_size=WINDOW_SIZE):
    """Pure-JAX reference mirroring torch's _ssim (for correctness check)."""
    B, C, H, W = img1.shape
    pad = window_size // 2
    kern = jnp.broadcast_to(
        jnp.asarray(_WINDOW), (C, 1, window_size, window_size)
    ).astype(jnp.float32)

    def conv(x):
        return jax.lax.conv_general_dilated(
            x, kern, window_strides=(1, 1),
            padding=[(pad, pad), (pad, pad)],
            dimension_numbers=("NCHW", "OIHW", "NCHW"),
            feature_group_count=C,
        )

    mu1 = conv(img1)
    mu2 = conv(img2)
    mu1_sq = mu1 ** 2
    mu2_sq = mu2 ** 2
    mu1_mu2 = mu1 * mu2
    sigma1_sq = conv(img1 * img1) - mu1_sq
    sigma2_sq = conv(img2 * img2) - mu2_sq
    sigma12 = conv(img1 * img2) - mu1_mu2
    ssim_map = ((2 * mu1_mu2 + C1) * (2 * sigma12 + C2)) / (
        (mu1_sq + mu2_sq + C1) * (sigma1_sq + sigma2_sq + C2)
    )
    return ssim_map.mean()


if __name__ == "__main__":
    key = jax.random.PRNGKey(0)
    k1, k2 = jax.random.split(key)
    B, C, H, W = 2, 4, 16, 16
    img1 = jax.random.uniform(k1, (B, C, H, W), dtype=jnp.float32)
    img2 = jax.random.uniform(k2, (B, C, H, W), dtype=jnp.float32)

    out = jax.block_until_ready(ssim_pallas(img1, img2))
    ref = jax.block_until_ready(ssim_reference(img1, img2))

    assert out.shape == () and out.dtype == jnp.float32
    np.testing.assert_allclose(np.asarray(out), np.asarray(ref),
                               rtol=1e-4, atol=2e-5)
    print("KERNEL_OK")
</pallas_src>

<mosaic_0001>
module attributes {stable_mosaic.version = 11 : i64} {
  func.func @kernel(%arg0: i32, %arg1: memref<32x128xf32, #tpu.memory_space<vmem>>, %arg2: memref<32x128xf32, #tpu.memory_space<vmem>>, %arg3: memref<128x128xf32, #tpu.memory_space<vmem>>, %arg4: memref<22x1xf32, #tpu.memory_space<vmem>>, %arg5: memref<1x1x1xf32, #tpu.memory_space<vmem>>, %arg6: memref<160x128xf32, #tpu.memory_space<vmem>>) attributes {dimension_semantics = [#tpu.dimension_semantics<parallel>], iteration_bounds = array<i64: 1>, scalar_prefetch = 0 : i64, scratch_operands = 1 : i64, tpu.core_type = #tpu.core_type<tc>, window_params = [{transform_indices = @transform_0, window_bounds = array<i64: 32, 128>}, {transform_indices = @transform_1, window_bounds = array<i64: 32, 128>}, {pipeline_mode = #tpu.pipeline_mode<synchronous>, transform_indices = @transform_2, window_bounds = array<i64: 128, 128>}, {pipeline_mode = #tpu.pipeline_mode<synchronous>, transform_indices = @transform_3, window_bounds = array<i64: 22, 1>}, {transform_indices = @transform_4, window_bounds = array<i64: 1, 1, 1>}]} {
    %c0 = arith.constant 0 : index
    %c0_0 = arith.constant 0 : index
    %0 = vector.load %arg1[%c0, %c0_0] : memref<32x128xf32, #tpu.memory_space<vmem>>, vector<32x128xf32>
    %c0_1 = arith.constant 0 : index
    %c0_2 = arith.constant 0 : index
    %1 = vector.load %arg2[%c0_1, %c0_2] : memref<32x128xf32, #tpu.memory_space<vmem>>, vector<32x128xf32>
    %c0_3 = arith.constant 0 : index
    %c0_4 = arith.constant 0 : index
    %2 = vector.load %arg6[%c0_3, %c0_4] : memref<160x128xf32, #tpu.memory_space<vmem>>, vector<32x128xf32>
    tpu.vector_store %arg6[%c0_3, %c0_4], %0 {strides = array<i32>} : memref<160x128xf32, #tpu.memory_space<vmem>>, vector<32x128xf32>,
    %c32 = arith.constant 32 : index
    %c0_5 = arith.constant 0 : index
    %3 = vector.load %arg6[%c32, %c0_5] : memref<160x128xf32, #tpu.memory_space<vmem>>, vector<32x128xf32>
    tpu.vector_store %arg6[%c32, %c0_5], %1 {strides = array<i32>} : memref<160x128xf32, #tpu.memory_space<vmem>>, vector<32x128xf32>,
    %4 = arith.mulf %0, %0 : vector<32x128xf32>
    %c64 = arith.constant 64 : index
    %c0_6 = arith.constant 0 : index
    %5 = vector.load %arg6[%c64, %c0_6] : memref<160x128xf32, #tpu.memory_space<vmem>>, vector<32x128xf32>
    tpu.vector_store %arg6[%c64, %c0_6], %4 {strides = array<i32>} : memref<160x128xf32, #tpu.memory_space<vmem>>, vector<32x128xf32>,
    %6 = arith.mulf %1, %1 : vector<32x128xf32>
    %c96 = arith.constant 96 : index
    %c0_7 = arith.constant 0 : index
    %7 = vector.load %arg6[%c96, %c0_7] : memref<160x128xf32, #tpu.memory_space<vmem>>, vector<32x128xf32>
    tpu.vector_store %arg6[%c96, %c0_7], %6 {strides = array<i32>} : memref<160x128xf32, #tpu.memory_space<vmem>>, vector<32x128xf32>,
    %8 = arith.mulf %0, %1 : vector<32x128xf32>
    %c128 = arith.constant 128 : index
    %c0_8 = arith.constant 0 : index
    %9 = vector.load %arg6[%c128, %c0_8] : memref<160x128xf32, #tpu.memory_space<vmem>>, vector<32x128xf32>
    tpu.vector_store %arg6[%c128, %c0_8], %8 {strides = array<i32>} : memref<160x128xf32, #tpu.memory_space<vmem>>, vector<32x128xf32>,
    %c0_9 = arith.constant 0 : index
    %c0_10 = arith.constant 0 : index
    %10 = vector.load %arg6[%c0_9, %c0_10] : memref<160x128xf32, #tpu.memory_space<vmem>>, vector<160x128xf32>
    %c0_11 = arith.constant 0 : index
    %c0_12 = arith.constant 0 : index
    %11 = vector.load %arg3[%c0_11, %c0_12] : memref<128x128xf32, #tpu.memory_space<vmem>>, vector<128x128xf32>
    %cst = arith.constant dense<0.000000e+00> : vector<160x128xf32>
    %12 = tpu.matmul %10, %11, %cst {dimension_numbers = #tpu.dot_dimension_numbers<[1], [0], [0], [1], [0, 0, 1, 1], [], []>} : vector<160x128xf32>, vector<128x128xf32>, vector<160x128xf32> -> vector<160x128xf32>
    %13 = vector.extract_strided_slice %12 {offsets = [0, 0], sizes = [32, 128], strides = [1, 1]} : vector<160x128xf32> to vector<32x128xf32>
    %14 = vector.extract_strided_slice %13 {offsets = [0, 0], sizes = [22, 128], strides = [1, 1]} : vector<32x128xf32> to vector<22x128xf32>
    %cst_13 = arith.constant 0.00102838024 : f32
    %15 = vector.broadcast %cst_13 : f32 to vector<22x128xf32>
    %16 = arith.mulf %15, %14 : vector<22x128xf32>
    %17 = vector.extract_strided_slice %13 {offsets = [1, 0], sizes = [22, 128], strides = [1, 1]} : vector<32x128xf32> to vector<22x128xf32>
    %cst_14 = arith.constant 0.00759875868 : f32
    %18 = vector.broadcast %cst_14 : f32 to vector<22x128xf32>
    %19 = arith.mulf %18, %17 : vector<22x128xf32>
    %20 = arith.addf %16, %19 : vector<22x128xf32>
    %21 = vector.extract_strided_slice %13 {offsets = [2, 0], sizes = [22, 128], strides = [1, 1]} : vector<32x128xf32> to vector<22x128xf32>
    %cst_15 = arith.constant 0.0360007733 : f32
    %22 = vector.broadcast %cst_15 : f32 to vector<22x128xf32>
    %23 = arith.mulf %22, %21 : vector<22x128xf32>
    %24 = arith.addf %20, %23 : vector<22x128xf32>
    %25 = vector.extract_strided_slice %13 {offsets = [3, 0], sizes = [22, 128], strides = [1, 1]} : vector<32x128xf32> to vector<22x128xf32>
    %cst_16 = arith.constant 0.109360695 : f32
    %26 = vector.broadcast %cst_16 : f32 to vector<22x128xf32>
    %27 = arith.mulf %26, %25 : vector<22x128xf32>
    %28 = arith.addf %24, %27 : vector<22x128xf32>
    %29 = vector.extract_strided_slice %13 {offsets = [4, 0], sizes = [22, 128], strides = [1, 1]} : vector<32x128xf32> to vector<22x128xf32>
    %cst_17 = arith.constant 0.213005543 : f32
    %30 = vector.broadcast %cst_17 : f32 to vector<22x128xf32>
    %31 = arith.mulf %30, %29 : vector<22x128xf32>
    %32 = arith.addf %28, %31 : vector<22x128xf32>
    %33 = vector.extract_strided_slice %13 {offsets = [5, 0], sizes = [22, 128], strides = [1, 1]} : vector<32x128xf32> to vector<22x128xf32>
    %cst_18 = arith.constant 0.266011745 : f32
    %34 = vector.broadcast %cst_18 : f32 to vector<22x128xf32>
    %35 = arith.mulf %34, %33 : vector<22x128xf32>
    %36 = arith.addf %32, %35 : vector<22x128xf32>
    %37 = vector.extract_strided_slice %13 {offsets = [6, 0], sizes = [22, 128], strides = [1, 1]} : vector<32x128xf32> to vector<22x128xf32>
    %cst_19 = arith.constant 0.213005543 : f32
    %38 = vector.broadcast %cst_19 : f32 to vector<22x128xf32>
    %39 = arith.mulf %38, %37 : vector<22x128xf32>
    %40 = arith.addf %36, %39 : vector<22x128xf32>
    %41 = vector.extract_strided_slice %13 {offsets = [7, 0], sizes = [22, 128], strides = [1, 1]} : vector<32x128xf32> to vector<22x128xf32>
    %cst_20 = arith.constant 0.109360695 : f32
    %42 = vector.broadcast %cst_20 : f32 to vector<22x128xf32>
    %43 = arith.mulf %42, %41 : vector<22x128xf32>
    %44 = arith.addf %40, %43 : vector<22x128xf32>
    %45 = vector.extract_strided_slice %13 {offsets = [8, 0], sizes = [22, 128], strides = [1, 1]} : vector<32x128xf32> to vector<22x128xf32>
    %cst_21 = arith.constant 0.0360007733 : f32
    %46 = vector.broadcast %cst_21 : f32 to vector<22x128xf32>
    %47 = arith.mulf %46, %45 : vector<22x128xf32>
    %48 = arith.addf %44, %47 : vector<22x128xf32>
    %49 = vector.extract_strided_slice %13 {offsets = [9, 0], sizes = [22, 128], strides = [1, 1]} : vector<32x128xf32> to vector<22x128xf32>
    %cst_22 = arith.constant 0.00759875868 : f32
    %50 = vector.broadcast %cst_22 : f32 to vector<22x128xf32>
    %51 = arith.mulf %50, %49 : vector<22x128xf32>
    %52 = arith.addf %48, %51 : vector<22x128xf32>
    %53 = vector.extract_strided_slice %13 {offsets = [10, 0], sizes = [22, 128], strides = [1, 1]} : vector<32x128xf32> to vector<22x128xf32>
    %cst_23 = arith.constant 0.00102838024 : f32
    %54 = vector.broadcast %cst_23 : f32 to vector<22x128xf32>
    %55 = arith.mulf %54, %53 : vector<22x128xf32>
    %56 = arith.addf %52, %55 : vector<22x128xf32>
    %57 = vector.extract_strided_slice %12 {offsets = [32, 0], sizes = [32, 128], strides = [1, 1]} : vector<160x128xf32> to vector<32x128xf32>
    %58 = vector.extract_strided_slice %57 {offsets = [0, 0], sizes = [22, 128], strides = [1, 1]} : vector<32x128xf32> to vector<22x128xf32>
    %cst_24 = arith.constant 0.00102838024 : f32
    %59 = vector.broadcast %cst_24 : f32 to vector<22x128xf32>
    %60 = arith.mulf %59, %58 : vector<22x128xf32>
    %61 = vector.extract_strided_slice %57 {offsets = [1, 0], sizes = [22, 128], strides = [1, 1]} : vector<32x128xf32> to vector<22x128xf32>
    %cst_25 = arith.constant 0.00759875868 : f32
    %62 = vector.broadcast %cst_25 : f32 to vector<22x128xf32>
    %63 = arith.mulf %62, %61 : vector<22x128xf32>
    %64 = arith.addf %60, %63 : vector<22x128xf32>
    %65 = vector.extract_strided_slice %57 {offsets = [2, 0], sizes = [22, 128], strides = [1, 1]} : vector<32x128xf32> to vector<22x128xf32>
    %cst_26 = arith.constant 0.0360007733 : f32
    %66 = vector.broadcast %cst_26 : f32 to vector<22x128xf32>
    %67 = arith.mulf %66, %65 : vector<22x128xf32>
    %68 = arith.addf %64, %67 : vector<22x128xf32>
    %69 = vector.extract_strided_slice %57 {offsets = [3, 0], sizes = [22, 128], strides = [1, 1]} : vector<32x128xf32> to vector<22x128xf32>
    %cst_27 = arith.constant 0.109360695 : f32
    %70 = vector.broadcast %cst_27 : f32 to vector<22x128xf32>
    %71 = arith.mulf %70, %69 : vector<22x128xf32>
    %72 = arith.addf %68, %71 : vector<22x128xf32>
    %73 = vector.extract_strided_slice %57 {offsets = [4, 0], sizes = [22, 128], strides = [1, 1]} : vector<32x128xf32> to vector<22x128xf32>
    %cst_28 = arith.constant 0.213005543 : f32
    %74 = vector.broadcast %cst_28 : f32 to vector<22x128xf32>
    %75 = arith.mulf %74, %73 : vector<22x128xf32>
    %76 = arith.addf %72, %75 : vector<22x128xf32>
    %77 = vector.extract_strided_slice %57 {offsets = [5, 0], sizes = [22, 128], strides = [1, 1]} : vector<32x128xf32> to vector<22x128xf32>
    %cst_29 = arith.constant 0.266011745 : f32
    %78 = vector.broadcast %cst_29 : f32 to vector<22x128xf32>
    %79 = arith.mulf %78, %77 : vector<22x128xf32>
    %80 = arith.addf %76, %79 : vector<22x128xf32>
    %81 = vector.extract_strided_slice %57 {offsets = [6, 0], sizes = [22, 128], strides = [1, 1]} : vector<32x128xf32> to vector<22x128xf32>
    %cst_30 = arith.constant 0.213005543 : f32
    %82 = vector.broadcast %cst_30 : f32 to vector<22x128xf32>
    %83 = arith.mulf %82, %81 : vector<22x128xf32>
    %84 = arith.addf %80, %83 : vector<22x128xf32>
    %85 = vector.extract_strided_slice %57 {offsets = [7, 0], sizes = [22, 128], strides = [1, 1]} : vector<32x128xf32> to vector<22x128xf32>
    %cst_31 = arith.constant 0.109360695 : f32
    %86 = vector.broadcast %cst_31 : f32 to vector<22x128xf32>
    %87 = arith.mulf %86, %85 : vector<22x128xf32>
    %88 = arith.addf %84, %87 : vector<22x128xf32>
    %89 = vector.extract_strided_slice %57 {offsets = [8, 0], sizes = [22, 128], strides = [1, 1]} : vector<32x128xf32> to vector<22x128xf32>
    %cst_32 = arith.constant 0.0360007733 : f32
    %90 = vector.broadcast %cst_32 : f32 to vector<22x128xf32>
    %91 = arith.mulf %90, %89 : vector<22x128xf32>
    %92 = arith.addf %88, %91 : vector<22x128xf32>
    %93 = vector.extract_strided_slice %57 {offsets = [9, 0], sizes = [22, 128], strides = [1, 1]} : vector<32x128xf32> to vector<22x128xf32>
    %cst_33 = arith.constant 0.00759875868 : f32
    %94 = vector.broadcast %cst_33 : f32 to vector<22x128xf32>
    %95 = arith.mulf %94, %93 : vector<22x128xf32>
    %96 = arith.addf %92, %95 : vector<22x128xf32>
    %97 = vector.extract_strided_slice %57 {offsets = [10, 0], sizes = [22, 128], strides = [1, 1]} : vector<32x128xf32> to vector<22x128xf32>
    %cst_34 = arith.constant 0.00102838024 : f32
    %98 = vector.broadcast %cst_34 : f32 to vector<22x128xf32>
    %99 = arith.mulf %98, %97 : vector<22x128xf32>
    %100 = arith.addf %96, %99 : vector<22x128xf32>
    %101 = vector.extract_strided_slice %12 {offsets = [64, 0], sizes = [32, 128], strides = [1, 1]} : vector<160x128xf32> to vector<32x128xf32>
    %102 = vector.extract_strided_slice %101 {offsets = [0, 0], sizes = [22, 128], strides = [1, 1]} : vector<32x128xf32> to vector<22x128xf32>
    %cst_35 = arith.constant 0.00102838024 : f32
    %103 = vector.broadcast %cst_35 : f32 to vector<22x128xf32>
    %104 = arith.mulf %103, %102 : vector<22x128xf32>
    %105 = vector.extract_strided_slice %101 {offsets = [1, 0], sizes = [22, 128], strides = [1, 1]} : vector<32x128xf32> to vector<22x128xf32>
    %cst_36 = arith.constant 0.00759875868 : f32
    %106 = vector.broadcast %cst_36 : f32 to vector<22x128xf32>
    %107 = arith.mulf %106, %105 : vector<22x128xf32>
    %108 = arith.addf %104, %107 : vector<22x128xf32>
    %109 = vector.extract_strided_slice %101 {offsets = [2, 0], sizes = [22, 128], strides = [1, 1]} : vector<32x128xf32> to vector<22x128xf32>
    %cst_37 = arith.constant 0.0360007733 : f32
    %110 = vector.broadcast %cst_37 : f32 to vector<22x128xf32>
    %111 = arith.mulf %110, %109 : vector<22x128xf32>
    %112 = arith.addf %108, %111 : vector<22x128xf32>
    %113 = vector.extract_strided_slice %101 {offsets = [3, 0], sizes = [22, 128], strides = [1, 1]} : vector<32x128xf32> to vector<22x128xf32>
    %cst_38 = arith.constant 0.109360695 : f32
    %114 = vector.broadcast %cst_38 : f32 to vector<22x128xf32>
    %115 = arith.mulf %114, %113 : vector<22x128xf32>
    %116 = arith.addf %112, %115 : vector<22x128xf32>
    %117 = vector.extract_strided_slice %101 {offsets = [4, 0], sizes = [22, 128], strides = [1, 1]} : vector<32x128xf32> to vector<22x128xf32>
    %cst_39 = arith.constant 0.213005543 : f32
    %118 = vector.broadcast %cst_39 : f32 to vector<22x128xf32>
    %119 = arith.mulf %118, %117 : vector<22x128xf32>
    %120 = arith.addf %116, %119 : vector<22x128xf32>
    %121 = vector.extract_strided_slice %101 {offsets = [5, 0], sizes = [22, 128], strides = [1, 1]} : vector<32x128xf32> to vector<22x128xf32>
    %cst_40 = arith.constant 0.266011745 : f32
    %122 = vector.broadcast %cst_40 : f32 to vector<22x128xf32>
    %123 = arith.mulf %122, %121 : vector<22x128xf32>
    %124 = arith.addf %120, %123 : vector<22x128xf32>
    %125 = vector.extract_strided_slice %101 {offsets = [6, 0], sizes = [22, 128], strides = [1, 1]} : vector<32x128xf32> to vector<22x128xf32>
    %cst_41 = arith.constant 0.213005543 : f32
    %126 = vector.broadcast %cst_41 : f32 to vector<22x128xf32>
    %127 = arith.mulf %126, %125 : vector<22x128xf32>
    %128 = arith.addf %124, %127 : vector<22x128xf32>
    %129 = vector.extract_strided_slice %101 {offsets = [7, 0], sizes = [22, 128], strides = [1, 1]} : vector<32x128xf32> to vector<22x128xf32>
    %cst_42 = arith.constant 0.109360695 : f32
    %130 = vector.broadcast %cst_42 : f32 to vector<22x128xf32>
    %131 = arith.mulf %130, %129 : vector<22x128xf32>
    %132 = arith.addf %128, %131 : vector<22x128xf32>
    %133 = vector.extract_strided_slice %101 {offsets = [8, 0], sizes = [22, 128], strides = [1, 1]} : vector<32x128xf32> to vector<22x128xf32>
    %cst_43 = arith.constant 0.0360007733 : f32
    %134 = vector.broadcast %cst_43 : f32 to vector<22x128xf32>
    %135 = arith.mulf %134, %133 : vector<22x128xf32>
    %136 = arith.addf %132, %135 : vector<22x128xf32>
    %137 = vector.extract_strided_slice %101 {offsets = [9, 0], sizes = [22, 128], strides = [1, 1]} : vector<32x128xf32> to vector<22x128xf32>
    %cst_44 = arith.constant 0.00759875868 : f32
    %138 = vector.broadcast %cst_44 : f32 to vector<22x128xf32>
    %139 = arith.mulf %138, %137 : vector<22x128xf32>
    %140 = arith.addf %136, %139 : vector<22x128xf32>
    %141 = vector.extract_strided_slice %101 {offsets = [10, 0], sizes = [22, 128], strides = [1, 1]} : vector<32x128xf32> to vector<22x128xf32>
    %cst_45 = arith.constant 0.00102838024 : f32
    %142 = vector.broadcast %cst_45 : f32 to vector<22x128xf32>
    %143 = arith.mulf %142, %141 : vector<22x128xf32>
    %144 = arith.addf %140, %143 : vector<22x128xf32>
    %145 = vector.extract_strided_slice %12 {offsets = [96, 0], sizes = [32, 128], strides = [1, 1]} : vector<160x128xf32> to vector<32x128xf32>
    %146 = vector.extract_strided_slice %145 {offsets = [0, 0], sizes = [22, 128], strides = [1, 1]} : vector<32x128xf32> to vector<22x128xf32>
    %cst_46 = arith.constant 0.00102838024 : f32
    %147 = vector.broadcast %cst_46 : f32 to vector<22x128xf32>
    %148 = arith.mulf %147, %146 : vector<22x128xf32>
    %149 = vector.extract_strided_slice %145 {offsets = [1, 0], sizes = [22, 128], strides = [1, 1]} : vector<32x128xf32> to vector<22x128xf32>
    %cst_47 = arith.constant 0.00759875868 : f32
    %150 = vector.broadcast %cst_47 : f32 to vector<22x128xf32>
    %151 = arith.mulf %150, %149 : vector<22x128xf32>
    %152 = arith.addf %148, %151 : vector<22x128xf32>
    %153 = vector.extract_strided_slice %145 {offsets = [2, 0], sizes = [22, 128], strides = [1, 1]} : vector<32x128xf32> to vector<22x128xf32>
    %cst_48 = arith.constant 0.0360007733 : f32
    %154 = vector.broadcast %cst_48 : f32 to vector<22x128xf32>
    %155 = arith.mulf %154, %153 : vector<22x128xf32>
    %156 = arith.addf %152, %155 : vector<22x128xf32>
    %157 = vector.extract_strided_slice %145 {offsets = [3, 0], sizes = [22, 128], strides = [1, 1]} : vector<32x128xf32> to vector<22x128xf32>
    %cst_49 = arith.constant 0.109360695 : f32
    %158 = vector.broadcast %cst_49 : f32 to vector<22x128xf32>
    %159 = arith.mulf %158, %157 : vector<22x128xf32>
    %160 = arith.addf %156, %159 : vector<22x128xf32>
    %161 = vector.extract_strided_slice %145 {offsets = [4, 0], sizes = [22, 128], strides = [1, 1]} : vector<32x128xf32> to vector<22x128xf32>
    %cst_50 = arith.constant 0.213005543 : f32
    %162 = vector.broadcast %cst_50 : f32 to vector<22x128xf32>
    %163 = arith.mulf %162, %161 : vector<22x128xf32>
    %164 = arith.addf %160, %163 : vector<22x128xf32>
    %165 = vector.extract_strided_slice %145 {offsets = [5, 0], sizes = [22, 128], strides = [1, 1]} : vector<32x128xf32> to vector<22x128xf32>
    %cst_51 = arith.constant 0.266011745 : f32
    %166 = vector.broadcast %cst_51 : f32 to vector<22x128xf32>
    %167 = arith.mulf %166, %165 : vector<22x128xf32>
    %168 = arith.addf %164, %167 : vector<22x128xf32>
    %169 = vector.extract_strided_slice %145 {offsets = [6, 0], sizes = [22, 128], strides = [1, 1]} : vector<32x128xf32> to vector<22x128xf32>
    %cst_52 = arith.constant 0.213005543 : f32
    %170 = vector.broadcast %cst_52 : f32 to vector<22x128xf32>
    %171 = arith.mulf %170, %169 : vector<22x128xf32>
    %172 = arith.addf %168, %171 : vector<22x128xf32>
    %173 = vector.extract_strided_slice %145 {offsets = [7, 0], sizes = [22, 128], strides = [1, 1]} : vector<32x128xf32> to vector<22x128xf32>
    %cst_53 = arith.constant 0.109360695 : f32
    %174 = vector.broadcast %cst_53 : f32 to vector<22x128xf32>
    %175 = arith.mulf %174, %173 : vector<22x128xf32>
    %176 = arith.addf %172, %175 : vector<22x128xf32>
    %177 = vector.extract_strided_slice %145 {offsets = [8, 0], sizes = [22, 128], strides = [1, 1]} : vector<32x128xf32> to vector<22x128xf32>
    %cst_54 = arith.constant 0.0360007733 : f32
    %178 = vector.broadcast %cst_54 : f32 to vector<22x128xf32>
    %179 = arith.mulf %178, %177 : vector<22x128xf32>
    %180 = arith.addf %176, %179 : vector<22x128xf32>
    %181 = vector.extract_strided_slice %145 {offsets = [9, 0], sizes = [22, 128], strides = [1, 1]} : vector<32x128xf32> to vector<22x128xf32>
    %cst_55 = arith.constant 0.00759875868 : f32
    %182 = vector.broadcast %cst_55 : f32 to vector<22x128xf32>
    %183 = arith.mulf %182, %181 : vector<22x128xf32>
    %184 = arith.addf %180, %183 : vector<22x128xf32>
    %185 = vector.extract_strided_slice %145 {offsets = [10, 0], sizes = [22, 128], strides = [1, 1]} : vector<32x128xf32> to vector<22x128xf32>
    %cst_56 = arith.constant 0.00102838024 : f32
    %186 = vector.broadcast %cst_56 : f32 to vector<22x128xf32>
    %187 = arith.mulf %186, %185 : vector<22x128xf32>
    %188 = arith.addf %184, %187 : vector<22x128xf32>
    %189 = vector.extract_strided_slice %12 {offsets = [128, 0], sizes = [32, 128], strides = [1, 1]} : vector<160x128xf32> to vector<32x128xf32>
    %190 = vector.extract_strided_slice %189 {offsets = [0, 0], sizes = [22, 128], strides = [1, 1]} : vector<32x128xf32> to vector<22x128xf32>
    %cst_57 = arith.constant 0.00102838024 : f32
    %191 = vector.broadcast %cst_57 : f32 to vector<22x128xf32>
    %192 = arith.mulf %191, %190 : vector<22x128xf32>
    %193 = vector.extract_strided_slice %189 {offsets = [1, 0], sizes = [22, 128], strides = [1, 1]} : vector<32x128xf32> to vector<22x128xf32>
    %cst_58 = arith.constant 0.00759875868 : f32
    %194 = vector.broadcast %cst_58 : f32 to vector<22x128xf32>
    %195 = arith.mulf %194, %193 : vector<22x128xf32>
    %196 = arith.addf %192, %195 : vector<22x128xf32>
    %197 = vector.extract_strided_slice %189 {offsets = [2, 0], sizes = [22, 128], strides = [1, 1]} : vector<32x128xf32> to vector<22x128xf32>
    %cst_59 = arith.constant 0.0360007733 : f32
    %198 = vector.broadcast %cst_59 : f32 to vector<22x128xf32>
    %199 = arith.mulf %198, %197 : vector<22x128xf32>
    %200 = arith.addf %196, %199 : vector<22x128xf32>
    %201 = vector.extract_strided_slice %189 {offsets = [3, 0], sizes = [22, 128], strides = [1, 1]} : vector<32x128xf32> to vector<22x128xf32>
    %cst_60 = arith.constant 0.109360695 : f32
    %202 = vector.broadcast %cst_60 : f32 to vector<22x128xf32>
    %203 = arith.mulf %202, %201 : vector<22x128xf32>
    %204 = arith.addf %200, %203 : vector<22x128xf32>
    %205 = vector.extract_strided_slice %189 {offsets = [4, 0], sizes = [22, 128], strides = [1, 1]} : vector<32x128xf32> to vector<22x128xf32>
    %cst_61 = arith.constant 0.213005543 : f32
    %206 = vector.broadcast %cst_61 : f32 to vector<22x128xf32>
    %207 = arith.mulf %206, %205 : vector<22x128xf32>
    %208 = arith.addf %204, %207 : vector<22x128xf32>
    %209 = vector.extract_strided_slice %189 {offsets = [5, 0], sizes = [22, 128], strides = [1, 1]} : vector<32x128xf32> to vector<22x128xf32>
    %cst_62 = arith.constant 0.266011745 : f32
    %210 = vector.broadcast %cst_62 : f32 to vector<22x128xf32>
    %211 = arith.mulf %210, %209 : vector<22x128xf32>
    %212 = arith.addf %208, %211 : vector<22x128xf32>
    %213 = vector.extract_strided_slice %189 {offsets = [6, 0], sizes = [22, 128], strides = [1, 1]} : vector<32x128xf32> to vector<22x128xf32>
    %cst_63 = arith.constant 0.213005543 : f32
    %214 = vector.broadcast %cst_63 : f32 to vector<22x128xf32>
    %215 = arith.mulf %214, %213 : vector<22x128xf32>
    %216 = arith.addf %212, %215 : vector<22x128xf32>
    %217 = vector.extract_strided_slice %189 {offsets = [7, 0], sizes = [22, 128], strides = [1, 1]} : vector<32x128xf32> to vector<22x128xf32>
    %cst_64 = arith.constant 0.109360695 : f32
    %218 = vector.broadcast %cst_64 : f32 to vector<22x128xf32>
    %219 = arith.mulf %218, %217 : vector<22x128xf32>
    %220 = arith.addf %216, %219 : vector<22x128xf32>
    %221 = vector.extract_strided_slice %189 {offsets = [8, 0], sizes = [22, 128], strides = [1, 1]} : vector<32x128xf32> to vector<22x128xf32>
    %cst_65 = arith.constant 0.0360007733 : f32
    %222 = vector.broadcast %cst_65 : f32 to vector<22x128xf32>
    %223 = arith.mulf %222, %221 : vector<22x128xf32>
    %224 = arith.addf %220, %223 : vector<22x128xf32>
    %225 = vector.extract_strided_slice %189 {offsets = [9, 0], sizes = [22, 128], strides = [1, 1]} : vector<32x128xf32> to vector<22x128xf32>
    %cst_66 = arith.constant 0.00759875868 : f32
    %226 = vector.broadcast %cst_66 : f32 to vector<22x128xf32>
    %227 = arith.mulf %226, %225 : vector<22x128xf32>
    %228 = arith.addf %224, %227 : vector<22x128xf32>
    %229 = vector.extract_strided_slice %189 {offsets = [10, 0], sizes = [22, 128], strides = [1, 1]} : vector<32x128xf32> to vector<22x128xf32>
    %cst_67 = arith.constant 0.00102838024 : f32
    %230 = vector.broadcast %cst_67 : f32 to vector<22x128xf32>
    %231 = arith.mulf %230, %229 : vector<22x128xf32>
    %232 = arith.addf %228, %231 : vector<22x128xf32>
    %233 = arith.mulf %56, %56 : vector<22x128xf32>
    %234 = arith.mulf %100, %100 : vector<22x128xf32>
    %235 = arith.mulf %56, %100 : vector<22x128xf32>
    %236 = arith.subf %144, %233 : vector<22x128xf32>
    %237 = arith.subf %188, %234 : vector<22x128xf32>
    %238 = arith.subf %232, %235 : vector<22x128xf32>
    %cst_68 = arith.constant 2.000000e+00 : f32
    %239 = vector.broadcast %cst_68 : f32 to vector<22x128xf32>
    %240 = arith.mulf %239, %235 : vector<22x128xf32>
    %cst_69 = arith.constant 9.99999974E-5 : f32
    %241 = vector.broadcast %cst_69 : f32 to vector<22x128xf32>
    %242 = arith.addf %240, %241 : vector<22x128xf32>
    %cst_70 = arith.constant 2.000000e+00 : f32
    %243 = vector.broadcast %cst_70 : f32 to vector<22x128xf32>
    %244 = arith.mulf %243, %238 : vector<22x128xf32>
    %cst_71 = arith.constant 8.99999984E-4 : f32
    %245 = vector.broadcast %cst_71 : f32 to vector<22x128xf32>
    %246 = arith.addf %244, %245 : vector<22x128xf32>
    %247 = arith.mulf %242, %246 : vector<22x128xf32>
    %248 = arith.addf %233, %234 : vector<22x128xf32>
    %cst_72 = arith.constant 9.99999974E-5 : f32
    %249 = vector.broadcast %cst_72 : f32 to vector<22x128xf32>
    %250 = arith.addf %248, %249 : vector<22x128xf32>
    %251 = arith.addf %236, %237 : vector<22x128xf32>
    %cst_73 = arith.constant 8.99999984E-4 : f32
    %252 = vector.broadcast %cst_73 : f32 to vector<22x128xf32>
    %253 = arith.addf %251, %252 : vector<22x128xf32>
    %254 = arith.mulf %250, %253 : vector<22x128xf32>
    %255 = arith.divf %247, %254 : vector<22x128xf32>
    %c0_74 = arith.constant 0 : index
    %c0_75 = arith.constant 0 : index
    %256 = vector.load %arg4[%c0_74, %c0_75] : memref<22x1xf32, #tpu.memory_space<vmem>>, vector<22x1xf32>
    %257 = vector.broadcast %256 : vector<22x1xf32> to vector<22x128xf32>
    %258 = arith.mulf %255, %257 : vector<22x128xf32>
    %259 = vector.shape_cast %258 : vector<22x128xf32> to vector<1x22x128xf32>
    %cst_76 = arith.constant dense<0.000000e+00> : vector<1xf32>
    %260 = vector.multi_reduction <add>, %259, %cst_76 [1, 2] : vector<1x22x128xf32> to vector<1xf32>
    %261 = vector.shape_cast %260 : vector<1xf32> to vector<1x1x1xf32>
    %262 = vector.extract %261[0, 0, 0] : f32 from vector<1x1x1xf32>
    %263 = vector.broadcast %262 : f32 to vector<1x1xf32>
    %264 = vector.shape_cast %263 : vector<1x1xf32> to vector<1x1x1xf32>
    %c0_77 = arith.constant 0 : index
    %c0_78 = arith.constant 0 : index
    %c0_79 = arith.constant 0 : index
    %265 = vector.load %arg5[%c0_77, %c0_78, %c0_79] : memref<1x1x1xf32, #tpu.memory_space<vmem>>, vector<1x1x1xf32>
    tpu.vector_store %arg5[%c0_77, %c0_78, %c0_79], %264 {strides = array<i32>} : memref<1x1x1xf32, #tpu.memory_space<vmem>>, vector<1x1x1xf32>,
    return
  }
  func.func @transform_0(%arg0: i32) -> (i32, i32) {
    %c0_i32 = arith.constant 0 : i32
    %c0_i32_0 = arith.constant 0 : i32
    return %arg0, %c0_i32 : i32, i32
  }
  func.func @transform_1(%arg0: i32) -> (i32, i32) {
    %c0_i32 = arith.constant 0 : i32
    %c0_i32_0 = arith.constant 0 : i32
    return %arg0, %c0_i32 : i32, i32
  }
  func.func @transform_2(%arg0: i32) -> (i32, i32) {
    %c0_i32 = arith.constant 0 : i32
    %c0_i32_0 = arith.constant 0 : i32
    %c0_i32_1 = arith.constant 0 : i32
    return %c0_i32, %c0_i32_0 : i32, i32
  }
  func.func @transform_3(%arg0: i32) -> (i32, i32) {
    %c0_i32 = arith.constant 0 : i32
    %c0_i32_0 = arith.constant 0 : i32
    %c0_i32_1 = arith.constant 0 : i32
    return %c0_i32, %c0_i32_0 : i32, i32
  }
  func.func @transform_4(%arg0: i32) -> (i32, i32, i32) {
    %c0_i32 = arith.constant 0 : i32
    %c0_i32_0 = arith.constant 0 : i32
    %c0_i32_1 = arith.constant 0 : i32
    return %arg0, %c0_i32, %c0_i32_0 : i32, i32, i32
  }
}

</mosaic_0001>

<bundles_post_ra>
// kernel: tpu_custom_call.1
= control target key start
LH: loop header
LB: loop body
LE: loop exit
PB: predicated region body
PF: predicated region fallthrough
CT: control target
= control target key end

     0   :  { %9 = vsyncpa [#allocation4], 0  ;;  %s2208_s0 = inlined_call_operand.hbm [shape: f32[32,128], index: 0, kind: input, shape index: {}]   ;;  %s2209_s1 = inlined_call_operand.hbm [shape: f32[32,128], index: 1, kind: input, shape index: {}]   ;;  %s2210_s2 = inlined_call_operand.hbm [shape: f32[128,128], index: 2, kind: input, shape index: {}]   ;;  %s2211_s3 = inlined_call_operand.vmem [shape: f32[22,1], index: 3, kind: input, shape index: {}]   ;;  %s2212_s4 = inlined_call_operand.hbm [shape: f32[1,1,1], index: 4, kind: output, shape index: {}]  }
   0x1   :  { %10 = vsyncpa [#allocation7], 0 }
   0x2   :  { %11 = vsyncpa [#allocation5], 0  ;;  %s1416_s15 = smov [#allocation6]   ;;  %s1417_s17 = smov [#allocation3]  }
   0x3   :  { %s29_s16 = sshll.u32 %s1416_s15, 4  ;;  %s17_s18 = sshll.u32 %s1417_s17, 4  ;;  %s30_s16 = int_to_ptr.vmem [resolvable:$true] %s29_s16  ;;  %s18_s18 = int_to_ptr.vmem [resolvable:$true] %s17_s18 }
   0x4   :  { %s1338_s19 = scalar_lea.vmem %s30_s16, 512  ;;  %p1343_p1 = scmp.lt.s32.totalorder %s30_s16, %s30_s16 }
   0x5   :  { %p1339_p0 = scmp.ne.s32.totalorder %s30_s16, %s1338_s19  ;;  %p1344_p2 = scmp.lt.s32.totalorder %s1338_s19, %s1338_s19 }
   0x7   :  { %p1345_p3 = por %p1344_p2, %p1343_p1 }
   0x9   :  { %p1346_p4 = pnand %p1345_p3, %p1339_p0 }
   0xb   :  { %1349 = shalt.err (!%p1346_p4)
}
   0xc   :  { %s1418_s20 = smov 128   ;;  %s1419_s21 = smov 8  }
   0xd   :  { %35 = dma.hbm_to_vmem [thread:$0]  %s2209_s1, 512, %s30_s16, [#allocation7], %s1418_s20, %s1418_s20, %s1419_s21  }
   0xe   :  { %s1358_s24 = scalar_lea.vmem %s18_s18, 512  ;;  %p1363_p6 = scmp.lt.s32.totalorder %s18_s18, %s18_s18 }
   0xf   :  { %p1359_p5 = scmp.ne.s32.totalorder %s18_s18, %s1358_s24  ;;  %p1364_p7 = scmp.lt.s32.totalorder %s1358_s24, %s1358_s24 }
  0x11   :  { %p1365_p8 = por %p1364_p7, %p1363_p6 }
  0x13   :  { %p1366_p9 = pnand %p1365_p8, %p1359_p5 }
  0x15   :  { %1369 = shalt.err (!%p1366_p9)
}
  0x16   :  { %23 = dma.hbm_to_vmem [thread:$0]  %s2208_s0, 512, %s18_s18, [#allocation4], %s1418_s20, %s1418_s20, %s1419_s21  }
  0x17   :  { %s1420_s27 = smov [#allocation8]  }
  0x18   :  { %s41_s28 = sshll.u32 %s1420_s27, 4  ;;  %s42_s28 = int_to_ptr.vmem [resolvable:$true] %s41_s28 }
  0x19   :  { %s1378_s29 = scalar_lea.vmem %s42_s28, 2048  ;;  %p1383_p11 = scmp.lt.s32.totalorder %s42_s28, %s42_s28 }
  0x1a   :  { %p1379_p10 = scmp.ne.s32.totalorder %s42_s28, %s1378_s29  ;;  %p1384_p12 = scmp.lt.s32.totalorder %s1378_s29, %s1378_s29 }
  0x1c   :  { %p1385_p13 = por %p1384_p12, %p1383_p11 }
  0x1e   :  { %p1386_p0 = pnand %p1385_p13, %p1379_p10 }
  0x20   :  { %1389 = shalt.err (!%p1386_p0)
}
  0x21   :  { %47 = dma.hbm_to_vmem [thread:$0]  %s2210_s2, 2048, %s42_s28, [#allocation7], %s1418_s20, %s1418_s20, %s1419_s21  }
  0x22   :  { %1410 = dma.done.wait [#allocation4], 512  }
  0x23   :  { %1411 = vsyncadd [#allocation4], 4294966784 }
  0x24   :  { %1412 = dma.done.wait [#allocation7], 2560  }
  0x25   :  { %1413 = vsyncadd [#allocation7], 4294964736  ;;  %v1421_v0 = vmov 0   ;;  %v134_v1 = vld [vmem:[#allocation8 + $0x78] sm:$0xff]  ;;  %v133_v2 = vld [vmem:[#allocation8 + $0x70] sm:$0xff]  ;;  %vm309_vm0 = vcmask 1046528  }
  0x26   :  { %1322 = vset.pattern.permute.xlu0 %v1421_v0  ;;  %1323 = vset.pattern.permute.xlu1 %v1421_v0  ;;  %v132_v3 = vld [vmem:[#allocation8 + $0x68] sm:$0xff]  ;;  %v131_v4 = vld [vmem:[#allocation8 + $0x60] sm:$0xff]  ;;  %v130_v5 = vld [vmem:[#allocation8 + $0x58] sm:$0xff]  ;;  %vm327_vm1 = vcmask 1045504   ;;  %vm347_vm2 = vcmask 1044480   ;;  %vm369_vm3 = vcmask 1043456  }
  0x27   :  { %1219 = vmatprep.subr.mxu0 %v134_v1  ;;  %1281 = vmatprep.subr.mxu1 %v134_v1  ;;  %v129_v6 = vld [vmem:[#allocation8 + $0x50] sm:$0xff]  ;;  %v128_v7 = vld [vmem:[#allocation8 + $0x48] sm:$0xff]  ;;  %v127_v8 = vld [vmem:[#allocation8 + $0x40] sm:$0xff]  ;;  %vm391_vm4 = vcmask 1042432   ;;  %vm405_vm5 = vcmask 1041408   ;;  %vm419_vm6 = vcmask 1040384  }
  0x28   :  { %1220 = vmatpush3.msra.mxu0 %v134_v1  ;;  %1297 = vmatpush3.msra.mxu1 %v134_v1  ;;  %v126_v9 = vld [vmem:[#allocation8 + $0x38] sm:$0xff]  ;;  %v125_v10 = vld [vmem:[#allocation8 + $0x30] sm:$0xff]  ;;  %v124_v11 = vld [vmem:[#allocation8 + $0x28] sm:$0xff]  ;;  %vm1165_vm7 = vcmask 0  }
  0x29   :  { %1221 = vmatprep.subr.mxu0 %v133_v2  ;;  %1282 = vmatprep.subr.mxu1 %v133_v2  ;;  %v123_v12 = vld [vmem:[#allocation8 + $0x20] sm:$0xff]  ;;  %v122_v13 = vld [vmem:[#allocation8 + $0x18] sm:$0xff]  ;;  %v121_v14 = vld [vmem:[#allocation8 + $0x10] sm:$0xff] }
  0x2a   :  { %1222 = vmatpush3.msra.mxu0 %v133_v2  ;;  %1298 = vmatpush3.msra.mxu1 %v133_v2  ;;  %v120_v15 = vld [vmem:[#allocation8 + $0x8] sm:$0xff]  ;;  %v61_v16 = vld [vmem:[#allocation3 + $0x10] sm:$0xff]  ;;  %v62_v17 = vld [vmem:[#allocation3 + $0x18] sm:$0xff] }
  0x2b   :  { %1223 = vmatprep.subr.mxu0 %v132_v3  ;;  %1283 = vmatprep.subr.mxu1 %v132_v3  ;;  %v119_v18 = vld [vmem:[#allocation8] sm:$0xff]  ;;  %v77_v20 = vmul.f32 %v61_v16, %v61_v16  ;;  %v78_v22 = vmul.f32 %v62_v17, %v62_v17  ;;  %v60_v23 = vld [vmem:[#allocation3 + $0x8] sm:$0xff]  ;;  %v65_v26 = vld [vmem:[#allocation6 + $0x10] sm:$0xff] }
  0x2c   :  { %1224 = vmatpush3.msra.mxu0 %v132_v3  ;;  %1299 = vmatpush3.msra.mxu1 %v132_v3  ;;  %v63_v19 = vld [vmem:[#allocation6] sm:$0xff]  ;;  %v64_v25 = vld [vmem:[#allocation6 + $0x8] sm:$0xff]  ;;  %v1133_v28 = vld [vmem:[%s2211_s3 + $0x10] sm:$0x3f]  ;;  %v85_v30 = vmul.f32 %v65_v26, %v65_v26  ;;  %v93_v37 = vmul.f32 %v65_v26, %v61_v16  ;;  %v76_v38 = vmul.f32 %v60_v23, %v60_v23 }
  0x2d   :  { %1225 = vmatprep.subr.mxu0 %v131_v4  ;;  %1284 = vmatprep.subr.mxu1 %v131_v4  ;;  %v59_v21 = vld [vmem:[#allocation3] sm:$0xff]  ;;  %v83_v24 = vmul.f32 %v63_v19, %v63_v19  ;;  %v84_v29 = vmul.f32 %v64_v25, %v64_v25  ;;  %v66_v31 = vld [vmem:[#allocation6 + $0x18] sm:$0xff]  ;;  %v1132_v32 = vld [vmem:[%s2211_s3 + $0x8] sm:$0xff]  ;;  %v92_v35 = vmul.f32 %v64_v25, %v60_v23 }
  0x2e   :  { %1226 = vmatpush3.msra.mxu0 %v131_v4  ;;  %1300 = vmatpush3.msra.mxu1 %v131_v4  ;;  %v1131_v27 = vld [vmem:[%s2211_s3] sm:$0xff]  ;;  %v86_v33 = vmul.f32 %v66_v31, %v66_v31  ;;  %v91_v34 = vmul.f32 %v63_v19, %v59_v21  ;;  %v75_v36 = vmul.f32 %v59_v21, %v59_v21  ;;  %s1422_s3 = smov [#allocation9]  }
  0x2f   :  { %1227 = vmatprep.subr.mxu0 %v130_v5  ;;  %1285 = vmatprep.subr.mxu1 %v130_v5  ;;  %v94_v39 = vmul.f32 %v66_v31, %v62_v17  ;;  %s1173_s9 = sshll.u32 %s1422_s3, 4  ;;  %s1174_s9 = int_to_ptr.vmem [resolvable:$true] %s1173_s9 }
  0x30   :  { %1228 = vmatpush3.msra.mxu0 %v130_v5  ;;  %1301 = vmatpush3.msra.mxu1 %v130_v5  ;;  %s1390_s11 = scalar_lea.vmem %s1174_s9, 16  ;;  %s1394_s12 = scalar_lea.vmem %s1174_s9, 32 }
  0x31   :  { %1229 = vmatprep.subr.mxu0 %v129_v6  ;;  %1286 = vmatprep.subr.mxu1 %v129_v6  ;;  %p1391_p1 = scmp.ne.s32.totalorder %s1174_s9, %s1390_s11  ;;  %p1395_p2 = scmp.lt.s32.totalorder %s1174_s9, %s1174_s9 }
  0x32   :  { %1230 = vmatpush3.msra.mxu0 %v129_v6  ;;  %1302 = vmatpush3.msra.mxu1 %v129_v6  ;;  %p1396_p3 = scmp.lt.s32.totalorder %s1394_s12, %s1390_s11 }
  0x33   :  { %1231 = vmatprep.subr.mxu0 %v128_v7  ;;  %1287 = vmatprep.subr.mxu1 %v128_v7 }
  0x34   :  { %1232 = vmatpush3.msra.mxu0 %v128_v7  ;;  %1303 = vmatpush3.msra.mxu1 %v128_v7  ;;  %p1397_p4 = por %p1396_p3, %p1395_p2 }
  0x35   :  { %1233 = vmatprep.subr.mxu0 %v127_v8  ;;  %1288 = vmatprep.subr.mxu1 %v127_v8 }
  0x36   :  { %1234 = vmatpush3.msra.mxu0 %v127_v8  ;;  %1304 = vmatpush3.msra.mxu1 %v127_v8  ;;  %p1398_p5 = pnand %p1397_p4, %p1391_p1 }
  0x37   :  { %1235 = vmatprep.subr.mxu0 %v126_v9  ;;  %1289 = vmatprep.subr.mxu1 %v126_v9 }
  0x38   :  { %1236 = vmatpush3.msra.mxu0 %v126_v9  ;;  %1305 = vmatpush3.msra.mxu1 %v126_v9 }
  0x39   :  { %1237 = vmatprep.subr.mxu0 %v125_v10  ;;  %1290 = vmatprep.subr.mxu1 %v125_v10 }
  0x3a   :  { %1238 = vmatpush3.msra.mxu0 %v125_v10  ;;  %1306 = vmatpush3.msra.mxu1 %v125_v10 }
  0x3b   :  { %1239 = vmatprep.subr.mxu0 %v124_v11  ;;  %1291 = vmatprep.subr.mxu1 %v124_v11 }
  0x3c   :  { %1240 = vmatpush3.msra.mxu0 %v124_v11  ;;  %1307 = vmatpush3.msra.mxu1 %v124_v11 }
  0x3d   :  { %1241 = vmatprep.subr.mxu0 %v123_v12  ;;  %1292 = vmatprep.subr.mxu1 %v123_v12 }
  0x3e   :  { %1242 = vmatpush3.msra.mxu0 %v123_v12  ;;  %1308 = vmatpush3.msra.mxu1 %v123_v12 }
  0x3f   :  { %1243 = vmatprep.subr.mxu0 %v122_v13  ;;  %1293 = vmatprep.subr.mxu1 %v122_v13 }
  0x40   :  { %1244 = vmatpush3.msra.mxu0 %v122_v13  ;;  %1309 = vmatpush3.msra.mxu1 %v122_v13 }
  0x41   :  { %1245 = vmatprep.subr.mxu0 %v121_v14  ;;  %1294 = vmatprep.subr.mxu1 %v121_v14 }
  0x42   :  { %1246 = vmatpush3.msra.mxu0 %v121_v14  ;;  %1310 = vmatpush3.msra.mxu1 %v121_v14 }
  0x43   :  { %1247 = vmatprep.subr.mxu0 %v120_v15  ;;  %1295 = vmatprep.subr.mxu1 %v120_v15 }
  0x44   :  { %1248 = vmatpush3.msra.mxu0 %v120_v15  ;;  %1311 = vmatpush3.msra.mxu1 %v120_v15 }
  0x45   :  { %1249 = vmatprep.subr.mxu0 %v119_v18  ;;  %1296 = vmatprep.subr.mxu1 %v119_v18 }
  0x46   :  { %1250 = vmatpush3.msra.mxu0 %v119_v18  ;;  %1312 = vmatpush3.msra.mxu1 %v119_v18 }
  0x47   :  { %1251 = vmatprep.mubr.f32.mxu0 %v59_v21  ;;  %1266 = vmatprep.mubr.f32.mxu1 %v77_v20 }
  0x48   :  { %1252 = vmatmul.mubr.f32.vlgmr.msra.gmra.mxu0 %v60_v23  ;;  %1267 = vmatmul.mubr.f32.vlgmr.msra.gmra.mxu1 %v78_v22 }
  0x49   :  { %1254 = vmatprep.mubr.f32.mxu0 %v61_v16  ;;  %1269 = vmatprep.mubr.f32.mxu1 %v83_v24 }
  0x4a   :  { %1136 = vperm.xlu0 %1322, %v1131_v27   ;;  %1146 = vperm.xlu1 %1323, %v1133_v28  }
  0x4c   :  { %1255 = vmatmul.mubr.f32.gmra.mxu0 %v62_v17  ;;  %1270 = vmatmul.mubr.f32.gmra.mxu1 %v84_v29 }
  0x4d   :  { %1257 = vmatprep.mubr.f32.mxu0 %v63_v19  ;;  %1272 = vmatprep.mubr.f32.mxu1 %v85_v30 }
  0x4e   :  { %1141 = vperm.xlu0 %1322, %v1132_v32  }
  0x50   :  { %1258 = vmatmul.mubr.f32.gmra.mxu0 %v64_v25  ;;  %1273 = vmatmul.mubr.f32.gmra.mxu1 %v86_v33 }
  0x51   :  { %1260 = vmatprep.mubr.f32.mxu0 %v65_v26  ;;  %1275 = vmatprep.mubr.f32.mxu1 %v91_v34 }
  0x54   :  { %1261 = vmatmul.mubr.f32.gmra.mxu0 %v66_v31  ;;  %1276 = vmatmul.mubr.f32.gmra.mxu1 %v92_v35 }
  0x55   :  { %1263 = vmatprep.mubr.f32.mxu0 %v75_v36  ;;  %1278 = vmatprep.mubr.f32.mxu1 %v93_v37 }
  0x58   :  { %1264 = vmatmul.mubr.f32.gmra.mxu0 %v76_v38  ;;  %1279 = vmatmul.mubr.f32.gmra.mxu1 %v94_v39 }
 0x108   :  { %v1253_v40 = vpop.f32.mrf.mxu0  ;;  %v1268_v43 = vpop.f32.mrf.mxu1 }
 0x109   :  { %v1466_v42 = vmul.f32 0.0075987587, %v1253_v40  ;;  %v1468_v46 = vmul.f32 0.0010283802, %v1253_v40  ;;  %v1471_v48 = vmul.f32 0.036000773, %v1253_v40 }
 0x10a   :  { %v201_v41 = vpop.f32.mrf.mxu0  ;;  %v251_v50 = vpop.f32.mrf.mxu1  ;;  %v1473_v51 = vmul.f32 0.109360695, %v1253_v40  ;;  %v1475_v52 = vmul.f32 0.21300554, %v1253_v40  ;;  %v1477_v53 = vmul.f32 0.26601174, %v1253_v40 }
 0x10b   :  { %v303_v44 = vmul.f32 0.0075987587, %v201_v41  ;;  %v321_v45 = vmul.f32 0.036000773, %v201_v41  ;;  %v311_v47 = vrot.slane %v1466_v42, 1  ;;  %v329_v59 = vrot.slane %v1471_v48, 2 }
 0x10c   :  { %v300_v54 = vmul.f32 0.0010283802, %v201_v41  ;;  %v1482_v57 = vmul.f32 0.109360695, %v201_v41  ;;  %v620_v58 = vmul.f32 0.0075987587, %v251_v50  ;;  %v1256_v30 = vpop.f32.mrf.mxu0 }
 0x10d   :  { %v310_v49 = vrot.slane %v303_v44, 1  ;;  %v328_v56 = vrot.slane %v321_v45, 2  ;;  %v1486_v61 = vmul.f32 0.109360695, %v1268_v43  ;;  %v349_v63 = vrot.slane %v1473_v51, 3 }
 0x10e   :  { %v371_v0 = vrot.slane %v1475_v52, 4  ;;  %v2222_v1 = vrot.slane %v1477_v53, 5  ;;  %v2221_v2 = vrot.slane %v1475_v52, 6  ;;  %v2220_v3 = vrot.slane %v1473_v51, 7 }
 0x10f   :  { %v312_v55 = vsel %vm309_vm0, %v310_v49, %v311_v47  ;;  %v1493_v4 = vmul.f32 0.0010283802, %v251_v50  ;;  %v1495_v5 = vrot.slane %v620_v58, 1  ;;  %v1497_v6 = vmul.f32 0.036000773, %v251_v50 }
 0x110   :  { %v318_v62 = vadd.f32 %v312_v55, %v300_v54  ;;  %v330_v7 = vsel %vm327_vm1, %v328_v56, %v329_v59  ;;  %v348_v8 = vrot.slane %v1482_v57, 3  ;;  %v361_v9 = vmul.f32 0.21300554, %v201_v41  ;;  %v211_v54 = vpop.f32.mrf.mxu0 }
 0x111   :  { %2260 = vst [vmem:[#allocation13_spill] sm:$0xff] %v1493_v4  ;;  %v1503_v10 = vmul.f32 0.109360695, %v251_v50  ;;  %v665_v11 = vrot.slane %v1486_v61, 3  ;;  %v676_v12 = vmul.f32 0.21300554, %v1268_v43  ;;  %v634_v19 = vadd.f32 %v1495_v5, %v1493_v4 }
 0x112   :  { %v336_v13 = vadd.f32 %v330_v7, %v318_v62  ;;  %v383_v14 = vmul.f32 0.26601174, %v201_v41  ;;  %v697_v15 = vmul.f32 0.26601174, %v1268_v43  ;;  %v1506_v16 = vmul.f32 0.0075987587, %v1268_v43 }
 0x113   :  { %v1508_v17 = vmul.f32 0.21300554, %v251_v50  ;;  %v733_v18 = vrot.slane %v1486_v61, 7  ;;  %v2219_v20 = vrot.slane %v1497_v6, 2  ;;  %v1514_v21 = vmul.f32 0.26601174, %v251_v50 }
 0x114   :  { %2261 = vst [vmem:[#allocation14_spill] sm:$0xff] %v1506_v16  ;;  %v1516_v22 = vmul.f32 0.0010283802, %v1268_v43  ;;  %v350_v23 = vsel %vm347_vm2, %v348_v8, %v349_v63  ;;  %v370_v24 = vrot.slane %v361_v9, 4  ;;  %v2218_v25 = vrot.slane %v1503_v10, 3 }
 0x115   :  { %v686_v26 = vrot.slane %v676_v12, 4  ;;  %v1522_v27 = vmul.f32 0.036000773, %v1268_v43  ;;  %v358_v28 = vadd.f32 %v350_v23, %v336_v13  ;;  %v392_v29 = vrot.slane %v383_v14, 5  ;;  %v1271_v23 = vpop.f32.mrf.mxu1 }
 0x116   :  { %2262 = vst [vmem:[#allocation15_spill] sm:$0xff] %v1516_v22  ;;  %v707_v31 = vrot.slane %v697_v15, 5  ;;  %v2213_v32 = vrot.slane %v1506_v16, 1  ;;  %v406_v33 = vrot.slane %v361_v9, 6  ;;  %v2217_v34 = vrot.slane %v1508_v17, 4 }
 0x117   :  { %2263 = vst [vmem:[#allocation16_spill] sm:$0xff] %v1522_v27  ;;  %v720_v35 = vrot.slane %v676_v12, 6  ;;  %v651_v36 = vadd.f32 %v2219_v20, %v634_v19  ;;  %v2216_v37 = vrot.slane %v1514_v21, 5  ;;  %v2215_v38 = vrot.slane %v1508_v17, 6 }
 0x118   :  { %v372_v40 = vsel %vm369_vm3, %v370_v24, %v371_v0  ;;  %v666_v41 = vsel %vm347_vm2, %v2218_v25, %v665_v11  ;;  %v2214_v43 = vrot.slane %v1503_v10, 7  ;;  %v394_v45 = vsel %vm391_vm4, %v392_v29, %v2222_v1 }
 0x119   :  { %v380_v44 = vadd.f32 %v372_v40, %v358_v28  ;;  %v420_v49 = vrot.slane %v1482_v57, 7  ;;  %v1542_v50 = vmul.f32 0.109360695, %v1256_v30  ;;  %v408_v55 = vsel %vm405_vm5, %v406_v33, %v2221_v2 }
 0x11a   :  { %v687_v56 = vsel %vm369_vm3, %v2217_v34, %v686_v26  ;;  %v1554_v58 = vsel %vm309_vm0, %v1495_v5, %v2213_v32  ;;  %v672_v57 = vadd.f32 %v666_v41, %v651_v36  ;;  %v708_v62 = vsel %vm391_vm4, %v2216_v37, %v707_v31  ;;  %v261_v32 = vpop.f32.mrf.mxu1 }
 0x11b   :  { %2264 = vst [vmem:[#allocation17_spill] sm:$0xff] %v1542_v50  ;;  %2265 = vst [vmem:[#allocation18_spill] sm:$0xff] %v1554_v58  ;;  %v721_v7 = vsel %vm405_vm5, %v2215_v38, %v720_v35  ;;  %v1563_v8 = vmul.f32 0.21300554, %v1256_v30  ;;  %v1568_v9 = vsel %vm419_vm6, %v2214_v43, %v733_v18  ;;  %v1570_v11 = vmul.f32 0.26601174, %v1256_v30 }
 0x11c   :  { %v305_v12 = vmul.f32 0.0075987587, %v211_v54  ;;  %v1572_v13 = vmul.f32 0.036000773, %v211_v54  ;;  %v402_v14 = vadd.f32 %v394_v45, %v380_v44  ;;  %v353_v15 = vrot.slane %v1542_v50, 3 }
 0x11d   :  { %v1575_v19 = vmul.f32 0.0075987587, %v1256_v30  ;;  %v1577_v24 = vmul.f32 0.109360695, %v211_v54  ;;  %v1580_v28 = vmul.f32 0.036000773, %v1256_v30  ;;  %v693_v31 = vadd.f32 %v687_v56, %v672_v57  ;;  %v1259_v56 = vpop.f32.mrf.mxu0 }
 0x11e   :  { %v1582_v29 = vrot.slane %v305_v12, 1  ;;  %v331_v18 = vrot.slane %v1572_v13, 2  ;;  %v1585_v33 = vmul.f32 0.0075987587, %v1271_v23  ;;  %v1587_v35 = vmul.f32 0.21300554, %v211_v54 }
 0x11f   :  { %2266 = vst [vmem:[#allocation19_spill] sm:$0xff] %v1577_v24  ;;  %2267 = vst [vmem:[#allocation20_spill] sm:$0xff] %v1580_v28  ;;  %v422_v36 = vsel %vm419_vm6, %v420_v49, %v2220_v3  ;;  %v375_v40 = vrot.slane %v1563_v8, 4  ;;  %v397_v41 = vrot.slane %v1570_v11, 5  ;;  %v351_v45 = vrot.slane %v1577_v24, 3 }
 0x120   :  { %v1598_v44 = vsel %vm309_vm0, %v311_v47, %v1582_v29  ;;  %v1603_v12 = vmul.f32 0.0010283802, %v1256_v30  ;;  %v1607_v26 = vmul.f32 0.0010283802, %v1271_v23  ;;  %v1609_v11 = vmul.f32 0.036000773, %v1271_v23 }
 0x121   :  { %v319_v49 = vadd.f32 %v1598_v44, %v1468_v46  ;;  %v1611_v42 = vmul.f32 0.0010283802, %v211_v54  ;;  %v332_v47 = vsel %vm327_vm1, %v329_v59, %v331_v18  ;;  %v373_v30 = vrot.slane %v1587_v35, 4 }
 0x122   :  { %2268 = vst [vmem:[#allocation21_spill] sm:$0xff] %v1603_v12  ;;  %2269 = vst [vmem:[#allocation22_spill] sm:$0xff] %v1607_v26  ;;  %v385_v57 = vmul.f32 0.26601174, %v211_v54  ;;  %v352_v38 = vsel %vm347_vm2, %v349_v63, %v351_v45  ;;  %v772_v37 = vmul.f32 0.0075987587, %v261_v32  ;;  %v714_v60 = vadd.f32 %v708_v62, %v693_v31 }
 0x123   :  { %v337_v61 = vadd.f32 %v332_v47, %v319_v49  ;;  %v320_v43 = vadd.f32 %v1582_v29, %v1611_v42  ;;  %v789_v34 = vmul.f32 0.036000773, %v261_v32  ;;  %v1623_v25 = vmul.f32 0.109360695, %v1271_v23 }
 0x124   :  { %v1625_v20 = vmul.f32 0.21300554, %v1271_v23  ;;  %v1627_v3 = vmul.f32 0.26601174, %v1271_v23  ;;  %v769_v49 = vmul.f32 0.0010283802, %v261_v32  ;;  %v416_v54 = vadd.f32 %v408_v55, %v402_v14 }
 0x125   :  { %v359_v59 = vadd.f32 %v352_v38, %v337_v61  ;;  %v778_v47 = vrot.slane %v772_v37, 1  ;;  %v2224_v2 = vrot.slane %v1609_v11, 2  ;;  %v795_v1 = vrot.slane %v789_v34, 2 }
 0x126   :  { %v806_v39 = vmul.f32 0.109360695, %v261_v32  ;;  %v338_v63 = vadd.f32 %v331_v18, %v320_v43  ;;  %v374_v62 = vsel %vm369_vm3, %v371_v0, %v373_v30  ;;  %v395_v31 = vrot.slane %v385_v57, 5 }
 0x127   :  { %v2270_v16 = vrot.slane %v1585_v33, 1  ;;  %v727_v61 = vadd.f32 %v721_v7, %v714_v60  ;;  %v2231_v37 = vrot.slane %v1623_v25, 3  ;;  %v381_v14 = vadd.f32 %v374_v62, %v359_v59 }
 0x128   :  { %v2229_v23 = vrot.slane %v1625_v20, 4  ;;  %v2228_v34 = vrot.slane %v1627_v3, 5  ;;  %v409_v43 = vrot.slane %v1587_v35, 6  ;;  %v354_v0 = vsel %vm347_vm2, %v351_v45, %v353_v15 }
 0x129   :  { %v780_v38 = vsel %vm309_vm0, %v778_v47, %v2270_v16  ;;  %v797_v57 = vsel %vm327_vm1, %v795_v1, %v2224_v2  ;;  %v814_v16 = vrot.slane %v806_v39, 3  ;;  %v827_v60 = vmul.f32 0.21300554, %v261_v32 }
 0x12a   :  { %v786_v18 = vadd.f32 %v780_v38, %v769_v49  ;;  %v2227_v7 = vrot.slane %v1625_v20, 6  ;;  %v360_v47 = vadd.f32 %v354_v0, %v338_v63  ;;  %v2271_v59 = vrot.slane %v1477_v53, 5 }
 0x12b   :  { %v848_v55 = vmul.f32 0.26601174, %v261_v32  ;;  %v1651_v35 = vadd.f32 %v1568_v9, %v727_v61  ;;  %v2226_v15 = vrot.slane %v1623_v25, 7  ;;  %v2225_v49 = vrot.slane %v1577_v24, 7 }
 0x12c   :  { %v396_v62 = vsel %vm391_vm4, %v2271_v59, %v395_v31  ;;  %v376_v1 = vsel %vm369_vm3, %v373_v30, %v375_v40  ;;  %v803_v2 = vadd.f32 %v797_v57, %v786_v18  ;;  %v1657_v63 = vadd.f32 %v422_v36, %v416_v54  ;;  %v221_v54 = vpop.f32.mrf.mxu0 }
 0x12d   :  { %2272 = vst [vmem:[#allocation23_spill] sm:$0xff] %v1651_v35  ;;  %v403_v45 = vadd.f32 %v396_v62, %v381_v14  ;;  %v398_v53 = vsel %vm391_vm4, %v395_v31, %v397_v41  ;;  %v2273_v32 = vrot.slane %v1475_v52, 6  ;;  %v816_v9 = vsel %vm347_vm2, %v814_v16, %v2231_v37 }
 0x12e   :  { %v835_v61 = vrot.slane %v827_v60, 4  ;;  %v382_v14 = vadd.f32 %v376_v1, %v360_v47  ;;  %v2274_v59 = vrot.slane %v1563_v8, 6  ;;  %v856_v30 = vrot.slane %v848_v55, 5  ;;  %v1274_v55 = vpop.f32.mrf.mxu1  ;;  %v1262_v12 = vpop.f32.mrf.mxu0 }
 0x12f   :  { %v410_v0 = vsel %vm405_vm5, %v2273_v32, %v409_v43  ;;  %v869_v36 = vrot.slane %v827_v60, 6  ;;  %v2276_v52 = vrot.slane %v1473_v51, 7  ;;  %v882_v31 = vrot.slane %v806_v39, 7 }
 0x130   :  { %v1669_v40 = vsel %vm405_vm5, %v409_v43, %v2274_v59  ;;  %v417_v18 = vadd.f32 %v410_v0, %v403_v45  ;;  %v1676_v57 = vmul.f32 0.0075987587, %v1259_v56  ;;  %v824_v16 = vadd.f32 %v816_v9, %v803_v2 }
 0x131   :  { %2275 = vst [vmem:[#allocation24_spill] sm:$0xff] %v1669_v40  ;;  %v424_v41 = vsel %vm419_vm6, %v2276_v52, %v2225_v49  ;;  %v1678_v47 = vmul.f32 0.0010283802, %v1259_v56  ;;  %v1680_v8 = vmul.f32 0.036000773, %v1259_v56  ;;  %v837_v60 = vsel %vm369_vm3, %v835_v61, %v2229_v23  ;;  %v271_v49 = vpop.f32.mrf.mxu1 }
 0x132   :  { %v1682_v43 = vmul.f32 0.109360695, %v1259_v56  ;;  %v1687_v62 = vmul.f32 0.21300554, %v1259_v56  ;;  %v464_v51 = vmul.f32 0.0075987587, %v221_v54  ;;  %v1689_v1 = vadd.f32 %v398_v53, %v382_v14 }
 0x133   :  { %v481_v45 = vmul.f32 0.036000773, %v221_v54  ;;  %v858_v2 = vsel %vm391_vm4, %v856_v30, %v2228_v34  ;;  %v871_v39 = vsel %vm405_vm5, %v869_v36, %v2227_v7  ;;  %v1697_v32 = vmul.f32 0.26601174, %v1259_v56 }
 0x134   :  { %2277 = vst [vmem:[#allocation25_spill] sm:$0xff] %v1689_v1  ;;  %v431_v0 = vadd.f32 %v424_v41, %v417_v18  ;;  %v884_v9 = vsel %vm419_vm6, %v882_v31, %v2226_v15  ;;  %v2230_v61 = vrot.slane %v1676_v57, 1  ;;  %v470_v59 = vrot.slane %v464_v51, 1 }
 0x135   :  { %v845_v53 = vadd.f32 %v837_v60, %v824_v16  ;;  %v2232_v14 = vrot.slane %v1680_v8, 2  ;;  %v461_v30 = vmul.f32 0.0010283802, %v221_v54  ;;  %v487_v36 = vrot.slane %v481_v45, 2 }
 0x136   :  { %v472_v56 = vsel %vm309_vm0, %v470_v59, %v2230_v61  ;;  %v1709_v18 = vmul.f32 0.109360695, %v221_v54  ;;  %v1715_v51 = vadd.f32 %v431_v0, %v1572_v13  ;;  %v774_v7 = vmul.f32 0.0075987587, %v271_v49 }
 0x137   :  { %v478_v60 = vadd.f32 %v472_v56, %v461_v30  ;;  %v1718_v34 = vmul.f32 0.036000773, %v271_v49  ;;  %v866_v23 = vadd.f32 %v858_v2, %v845_v53  ;;  %v1720_v59 = vmul.f32 0.109360695, %v1274_v55 }
 0x138   :  { %v519_v45 = vmul.f32 0.21300554, %v221_v54  ;;  %v1722_v61 = vmul.f32 0.0010283802, %v271_v49  ;;  %v489_v37 = vsel %vm327_vm1, %v487_v36, %v2232_v14  ;;  %v506_v30 = vrot.slane %v1709_v18, 3 }
 0x139   :  { %v1728_v56 = vrot.slane %v774_v7, 1  ;;  %v808_v13 = vmul.f32 0.109360695, %v271_v49  ;;  %v830_v0 = vmul.f32 0.21300554, %v1274_v55  ;;  %v495_v31 = vadd.f32 %v489_v37, %v478_v60 }
 0x13a   :  { %2278 = vst [vmem:[#allocation26_spill] sm:$0xff] %v1722_v61  ;;  %v851_v15 = vmul.f32 0.26601174, %v1274_v55  ;;  %v1730_v16 = vmul.f32 0.036000773, %v1274_v55  ;;  %v2281_v53 = vrot.slane %v1585_v33, 1  ;;  %v434_v36 = vadd.f32 %v1657_v63, %v1471_v48 }
 0x13b   :  { %v1732_v2 = vmul.f32 0.0075987587, %v1274_v55  ;;  %v798_v38 = vrot.slane %v1718_v34, 2  ;;  %v879_v7 = vadd.f32 %v871_v39, %v866_v23  ;;  %v819_v14 = vrot.slane %v1720_v59, 3 }
 0x13c   :  { %2279 = vst [vmem:[#allocation27_spill] sm:$0xff] %v1730_v16  ;;  %v782_v41 = vsel %vm309_vm0, %v2281_v53, %v1728_v56  ;;  %v540_v52 = vmul.f32 0.26601174, %v221_v54  ;;  %v788_v16 = vadd.f32 %v1728_v56, %v1722_v61  ;;  %v2282_v37 = vrot.slane %v1682_v43, 3 }
 0x13d   :  { %2280 = vst [vmem:[#allocation28_spill] sm:$0xff] %v1732_v2  ;;  %v527_v27 = vrot.slane %v519_v45, 4  ;;  %v817_v33 = vrot.slane %v808_v13, 3  ;;  %v829_v35 = vmul.f32 0.21300554, %v271_v49  ;;  %v840_v53 = vrot.slane %v830_v0, 4 }
 0x13e   :  { %v508_v60 = vsel %vm347_vm2, %v506_v30, %v2282_v37  ;;  %v787_v24 = vadd.f32 %v782_v41, %v1607_v26  ;;  %v850_v50 = vmul.f32 0.26601174, %v271_v49  ;;  %v861_v48 = vrot.slane %v851_v15, 5 }
 0x13f   :  { %v516_v28 = vadd.f32 %v508_v60, %v495_v31  ;;  %v874_v23 = vrot.slane %v830_v0, 6  ;;  %v1748_v63 = vmul.f32 0.0010283802, %v1274_v55  ;;  %v2284_v54 = vrot.slane %v1609_v11, 2 }
 0x140   :  { %v887_v40 = vrot.slane %v1720_v59, 7  ;;  %v548_v1 = vrot.slane %v540_v52, 5  ;;  %v561_v30 = vrot.slane %v519_v45, 6  ;;  %v805_v37 = vadd.f32 %v798_v38, %v788_v16 }
 0x141   :  { %2283 = vst [vmem:[#allocation29_spill] sm:$0xff] %v1748_v63  ;;  %v799_v39 = vsel %vm327_vm1, %v2284_v54, %v798_v38  ;;  %v892_v22 = vadd.f32 %v884_v9, %v879_v7  ;;  %v2285_v58 = vrot.slane %v1687_v62, 4  ;;  %v820_v49 = vsel %vm347_vm2, %v817_v33, %v819_v14 }
 0x142   :  { %v838_v15 = vrot.slane %v829_v35, 4  ;;  %v2240_v55 = vrot.slane %v1732_v2, 1  ;;  %v804_v60 = vadd.f32 %v799_v39, %v787_v24  ;;  %v859_v26 = vrot.slane %v850_v50, 5 }
 0x143   :  { %v529_v31 = vsel %vm369_vm3, %v527_v27, %v2285_v58  ;;  %v872_v59 = vrot.slane %v829_v35, 6  ;;  %v885_v52 = vrot.slane %v808_v13, 7  ;;  %v1761_v38 = vadd.f32 %v434_v36, %v1598_v44 }
 0x144   :  { %v537_v0 = vadd.f32 %v529_v31, %v516_v28  ;;  %v2286_v9 = vrot.slane %v1697_v32, 5  ;;  %v2287_v58 = vrot.slane %v1687_v62, 6  ;;  %v826_v50 = vadd.f32 %v820_v49, %v805_v37  ;;  %v231_v37 = vpop.f32.mrf.mxu0 }
 0x145   :  { %v2288_v28 = vrot.slane %v1623_v25, 3  ;;  %v2289_v16 = vrot.slane %v1625_v20, 4  ;;  %v841_v45 = vsel %vm369_vm3, %v838_v15, %v840_v53  ;;  %v2290_v7 = vrot.slane %v1627_v3, 5 }
 0x146   :  { %v550_v27 = vsel %vm391_vm4, %v548_v1, %v2286_v9  ;;  %v1769_v14 = vsel %vm405_vm5, %v561_v30, %v2287_v58  ;;  %v896_v1 = vadd.f32 %v892_v22, %v1609_v11  ;;  %v862_v30 = vsel %vm391_vm4, %v859_v26, %v861_v48  ;;  %v1277_v9 = vpop.f32.mrf.mxu1 }
 0x147   :  { %v818_v35 = vsel %vm347_vm2, %v2288_v28, %v817_v33  ;;  %v839_v44 = vsel %vm369_vm3, %v2289_v16, %v838_v15  ;;  %v1780_v13 = vadd.f32 %v550_v27, %v537_v0  ;;  %v860_v39 = vsel %vm391_vm4, %v2290_v7, %v859_v26 }
 0x148   :  { %v825_v36 = vadd.f32 %v818_v35, %v804_v60  ;;  %v2291_v33 = vrot.slane %v1625_v20, 6  ;;  %v875_v49 = vsel %vm405_vm5, %v872_v59, %v874_v23  ;;  %v2292_v53 = vrot.slane %v1623_v25, 7 }
 0x149   :  { %v1795_v11 = vmul.f32 0.109360695, %v1262_v12  ;;  %v847_v15 = vadd.f32 %v841_v45, %v826_v50  ;;  %v888_v3 = vsel %vm419_vm6, %v885_v52, %v887_v40  ;;  %v1802_v26 = vsel %vm309_vm0, %v1728_v56, %v2240_v55 }
 0x14a   :  { %v873_v31 = vsel %vm405_vm5, %v2291_v33, %v872_v59  ;;  %v1793_v22 = vsel %vm419_vm6, %v2292_v53, %v885_v52  ;;  %v1804_v20 = vmul.f32 0.21300554, %v1262_v12  ;;  %v1806_v48 = vadd.f32 %v896_v1, %v782_v41 }
 0x14b   :  { %2293 = vst [vmem:[#allocation30_spill] sm:$0xff] %v1795_v11  ;;  %v1809_v23 = vmul.f32 0.26601174, %v1262_v12  ;;  %v466_v0 = vmul.f32 0.0075987587, %v231_v37  ;;  %v846_v60 = vadd.f32 %v839_v44, %v825_v36  ;;  %v511_v56 = vrot.slane %v1795_v11, 3 }
 0x14c   :  { %2294 = vst [vmem:[#allocation31_spill] sm:$0xff] %v1804_v20  ;;  %2295 = vst [vmem:[#allocation32_spill] sm:$0xff] %v1806_v48  ;;  %v1811_v59 = vmul.f32 0.036000773, %v1262_v12  ;;  %v1813_v40 = vmul.f32 0.036000773, %v231_v37  ;;  %v868_v50 = vadd.f32 %v862_v30, %v847_v15 }
 0x14d   :  { %v1815_v52 = vmul.f32 0.109360695, %v231_v37  ;;  %v1819_v58 = vmul.f32 0.0075987587, %v1262_v12  ;;  %v1821_v41 = vrot.slane %v466_v0, 1  ;;  %v2298_v45 = vrot.slane %v1676_v57, 1  ;;  %v281_v0 = vpop.f32.mrf.mxu1 }
 0x14e   :  { %2296 = vst [vmem:[#allocation33_spill] sm:$0xff] %v1811_v59  ;;  %v1824_v35 = vmul.f32 0.0075987587, %v1277_v9  ;;  %v490_v16 = vrot.slane %v1813_v40, 2  ;;  %v1835_v7 = vmul.f32 0.21300554, %v231_v37  ;;  %v867_v33 = vadd.f32 %v860_v39, %v846_v60 }
 0x14f   :  { %2297 = vst [vmem:[#allocation34_spill] sm:$0xff] %v1815_v52  ;;  %v1832_v1 = vsel %vm309_vm0, %v2298_v45, %v1821_v41  ;;  %v509_v36 = vrot.slane %v1815_v52, 3  ;;  %v1838_v53 = vmul.f32 0.0010283802, %v231_v37  ;;  %v1843_v27 = vmul.f32 0.0010283802, %v1262_v12 }
 0x150   :  { %2299 = vst [vmem:[#allocation35_spill] sm:$0xff] %v1835_v7  ;;  %v479_v15 = vadd.f32 %v1832_v1, %v1678_v47  ;;  %v1845_v57 = vmul.f32 0.036000773, %v1277_v9  ;;  %v2301_v45 = vrot.slane %v1680_v8, 2  ;;  %v1853_v25 = vmul.f32 0.26601174, %v231_v37 }
 0x151   :  { %2300 = vst [vmem:[#allocation36_spill] sm:$0xff] %v1843_v27  ;;  %v480_v60 = vadd.f32 %v1821_v41, %v1838_v53  ;;  %v2302_v24 = vrot.slane %v1682_v43, 3  ;;  %v530_v12 = vrot.slane %v1835_v7, 4  ;;  %v926_v44 = vmul.f32 0.0075987587, %v281_v0 }
 0x152   :  { %v491_v54 = vsel %vm327_vm1, %v2301_v45, %v490_v16  ;;  %v943_v28 = vmul.f32 0.036000773, %v281_v0  ;;  %v881_v2 = vadd.f32 %v875_v49, %v868_v50  ;;  %v1859_v59 = vmul.f32 0.0010283802, %v1277_v9 }
 0x153   :  { %v496_v30 = vadd.f32 %v491_v54, %v479_v15  ;;  %v510_v55 = vsel %vm347_vm2, %v2302_v24, %v509_v36  ;;  %v1861_v45 = vmul.f32 0.109360695, %v1277_v9  ;;  %v880_v11 = vadd.f32 %v873_v31, %v867_v33 }
 0x154   :  { %v1864_v54 = vmul.f32 0.21300554, %v1277_v9  ;;  %v932_v37 = vrot.slane %v926_v44, 1  ;;  %v497_v48 = vadd.f32 %v490_v16, %v480_v60  ;;  %v551_v24 = vrot.slane %v1853_v25, 5 }
 0x155   :  { %v517_v39 = vadd.f32 %v510_v55, %v496_v30  ;;  %v923_v61 = vmul.f32 0.0010283802, %v281_v0  ;;  %v2303_v4 = vrot.slane %v1687_v62, 4  ;;  %v2304_v50 = vrot.slane %v1824_v35, 1  ;;  %v1265_v30 = vpop.f32.mrf.mxu0 }
 0x156   :  { %v949_v31 = vrot.slane %v943_v28, 2  ;;  %v1874_v33 = vmul.f32 0.109360695, %v281_v0  ;;  %v1876_v63 = vadd.f32 %v888_v3, %v881_v2  ;;  %v2255_v44 = vrot.slane %v1861_v45, 3 }
 0x157   :  { %v531_v49 = vsel %vm369_vm3, %v2303_v4, %v530_v12  ;;  %v934_v55 = vsel %vm309_vm0, %v932_v37, %v2304_v50  ;;  %v1879_v16 = vmul.f32 0.26601174, %v1277_v9  ;;  %v893_v60 = vadd.f32 %v1793_v22, %v880_v11 }
 0x158   :  { %2305 = vst [vmem:[#allocation37_spill] sm:$0xff] %v1874_v33  ;;  %2306 = vst [vmem:[#allocation38_spill] sm:$0xff] %v1876_v63  ;;  %v538_v25 = vadd.f32 %v531_v49, %v517_v39  ;;  %v2254_v15 = vrot.slane %v1864_v54, 4  ;;  %v512_v4 = vsel %vm347_vm2, %v509_v36, %v511_v56  ;;  %v2251_v27 = vrot.slane %v1835_v7, 6 }
 0x159   :  { %v518_v37 = vadd.f32 %v512_v4, %v497_v48  ;;  %v2307_v28 = vrot.slane %v1697_v32, 5  ;;  %v940_v2 = vadd.f32 %v934_v55, %v923_v61  ;;  %v1888_v3 = vmul.f32 0.0075987587, %v1265_v30 }
 0x15a   :  { %v2308_v9 = vrot.slane %v1845_v57, 2  ;;  %v968_v22 = vrot.slane %v1874_v33, 3  ;;  %v981_v11 = vmul.f32 0.21300554, %v281_v0  ;;  %v1002_v49 = vmul.f32 0.26601174, %v281_v0 }
 0x15b   :  { %v552_v50 = vsel %vm391_vm4, %v2307_v28, %v551_v24  ;;  %v2253_v56 = vrot.slane %v1879_v16, 5  ;;  %v625_v32 = vrot.slane %v1888_v3, 1  ;;  %v897_v4 = vadd.f32 %v893_v60, %v1718_v34 }
 0x15c   :  { %v951_v39 = vsel %vm327_vm1, %v949_v31, %v2308_v9  ;;  %v559_v48 = vadd.f32 %v552_v50, %v538_v25  ;;  %v2309_v55 = vrot.slane %v1804_v20, 4  ;;  %v1902_v31 = vmul.f32 0.036000773, %v1265_v30 }
 0x15d   :  { %v2310_v0 = vrot.slane %v1687_v62, 6  ;;  %v2252_v25 = vrot.slane %v1815_v52, 7  ;;  %v957_v50 = vadd.f32 %v951_v39, %v940_v2  ;;  %v970_v34 = vsel %vm347_vm2, %v968_v22, %v2255_v44 }
 0x15e   :  { %v533_v28 = vsel %vm369_vm3, %v530_v12, %v2309_v55  ;;  %v989_v60 = vrot.slane %v981_v11, 4  ;;  %v1010_v3 = vrot.slane %v1002_v49, 5  ;;  %v1915_v12 = vsel %vm309_vm0, %v625_v32, %v1495_v5 }
 0x15f   :  { %v539_v9 = vadd.f32 %v533_v28, %v518_v37  ;;  %v565_v36 = vsel %vm405_vm5, %v2310_v0, %v2251_v27  ;;  %v1023_v55 = vrot.slane %v981_v11, 6  ;;  %v1917_v28 = vmul.f32 0.0010283802, %v1265_v30 }
 0x160   :  { %v572_v37 = vadd.f32 %v565_v36, %v559_v48  ;;  %v1919_v62 = vmul.f32 0.109360695, %v1265_v30  ;;  %v1922_v0 = vadd.f32 %v1802_v26, %v897_v4  ;;  %v642_v39 = vrot.slane %v1902_v31, 2  ;;  %v241_v48 = vpop.f32.mrf.mxu0 }
 0x161   :  { %v1926_v22 = vmul.f32 0.21300554, %v1265_v30  ;;  %v2312_v49 = vrot.slane %v1809_v23, 5  ;;  %v978_v27 = vadd.f32 %v970_v34, %v957_v50  ;;  %v633_v11 = vadd.f32 %v1915_v12, %v1917_v28 }
 0x162   :  { %2311 = vst [vmem:[#allocation39_spill] sm:$0xff] %v1922_v0  ;;  %v1933_v36 = vmul.f32 0.26601174, %v1265_v30  ;;  %v2314_v26 = vrot.slane %v1682_v43, 7  ;;  %v991_v23 = vsel %vm369_vm3, %v989_v60, %v2254_v15  ;;  %v2315_v30 = vrot.slane %v1864_v54, 6 }
 0x163   :  { %v554_v5 = vsel %vm391_vm4, %v551_v24, %v2312_v49  ;;  %v1012_v24 = vsel %vm391_vm4, %v1010_v3, %v2253_v56  ;;  %v661_v49 = vrot.slane %v1919_v62, 3  ;;  %v618_v2 = vmul.f32 0.0075987587, %v241_v48 }
 0x164   :  { %v1935_v61 = vadd.f32 %v554_v5, %v539_v9  ;;  %v578_v4 = vsel %vm419_vm6, %v2314_v26, %v2252_v25  ;;  %v1951_v9 = vsel %vm405_vm5, %v1023_v55, %v2315_v30  ;;  %v1955_v5 = vpop.f32.mrf.mxu1  ;;  %v2316_v26 = vrot.slane %v1497_v6, 2 }
 0x165   :  { %v585_v50 = vadd.f32 %v578_v4, %v572_v37  ;;  %v682_v25 = vrot.slane %v1926_v22, 4  ;;  %v635_v3 = vmul.f32 0.036000773, %v241_v48  ;;  %v999_v37 = vadd.f32 %v991_v23, %v978_v27 }
 0x166   :  { %2313 = vst [vmem:[#allocation40_spill] sm:$0xff] %v1935_v61  ;;  %v645_v60 = vsel %vm327_vm1, %v642_v39, %v2316_v26  ;;  %v703_v56 = vrot.slane %v1933_v36, 5  ;;  %v652_v55 = vmul.f32 0.109360695, %v241_v48  ;;  %v716_v30 = vrot.slane %v1926_v22, 6  ;;  %v291_v7 = vpop.f32.mrf.mxu1 }
 0x167   :  { %v650_v4 = vadd.f32 %v645_v60, %v633_v11  ;;  %v624_v34 = vrot.slane %v618_v2, 1  ;;  %v641_v15 = vrot.slane %v635_v3, 2  ;;  %v673_v44 = vmul.f32 0.21300554, %v241_v48 }
 0x168   :  { %v1964_v63 = vadd.f32 %v585_v50, %v1813_v40  ;;  %v2317_v52 = vrot.slane %v1503_v10, 3  ;;  %v615_v61 = vmul.f32 0.0010283802, %v241_v48  ;;  %v2318_v27 = vrot.slane %v1611_v42, 2 }
 0x169   :  { %v2319_v11 = vrot.slane %v1468_v46, 2  ;;  %v2320_v2 = vrot.slane %v1508_v17, 4  ;;  %v626_v40 = vsel %vm309_vm0, %v624_v34, %v625_v32  ;;  %v660_v23 = vrot.slane %v652_v55, 3 }
 0x16a   :  { %v664_v26 = vsel %vm347_vm2, %v661_v49, %v2317_v52  ;;  %v694_v50 = vmul.f32 0.26601174, %v241_v48  ;;  %v1980_v60 = vadd.f32 %v1012_v24, %v999_v37  ;;  %v2321_v3 = vrot.slane %v1514_v21, 5 }
 0x16b   :  { %v1974_v36 = vsel %vm327_vm1, %v2319_v11, %v2318_v27  ;;  %v685_v22 = vsel %vm369_vm3, %v682_v25, %v2320_v2  ;;  %v671_v52 = vadd.f32 %v664_v26, %v650_v4  ;;  %v632_v0 = vadd.f32 %v626_v40, %v615_v61 }
 0x16c   :  { %v706_v20 = vsel %vm391_vm4, %v703_v56, %v2321_v3  ;;  %v2322_v46 = vrot.slane %v1508_v17, 6  ;;  %v643_v11 = vsel %vm327_vm1, %v641_v15, %v642_v39  ;;  %v681_v33 = vrot.slane %v673_v44, 4 }
 0x16d   :  { %v928_v2 = vmul.f32 0.0075987587, %v291_v7  ;;  %v729_v32 = vrot.slane %v1919_v62, 7  ;;  %v649_v34 = vadd.f32 %v643_v11, %v632_v0  ;;  %v1990_v48 = vmul.f32 0.036000773, %v291_v7 }
 0x16e   :  { %v719_v27 = vsel %vm405_vm5, %v716_v30, %v2322_v46  ;;  %v1992_v24 = vmul.f32 0.109360695, %v291_v7  ;;  %v662_v37 = vsel %vm347_vm2, %v660_v23, %v661_v49  ;;  %v702_v61 = vrot.slane %v694_v50, 5 }
 0x16f   :  { %v1996_v4 = vrot.slane %v928_v2, 1  ;;  %v692_v17 = vadd.f32 %v685_v22, %v671_v52  ;;  %v670_v26 = vadd.f32 %v662_v37, %v649_v34  ;;  %v715_v40 = vrot.slane %v673_v44, 6 }
 0x170   :  { %v952_v15 = vrot.slane %v1990_v48, 2  ;;  %v683_v39 = vsel %vm369_vm3, %v681_v33, %v682_v25  ;;  %v2323_v62 = vrot.slane %v1824_v35, 1  ;;  %v971_v3 = vrot.slane %v1992_v24, 3 }
 0x171   :  { %v2007_v46 = vmul.f32 0.21300554, %v291_v7  ;;  %v691_v49 = vadd.f32 %v683_v39, %v670_v26  ;;  %v2009_v23 = vmul.f32 0.0010283802, %v291_v7  ;;  %v2324_v22 = vrot.slane %v1845_v57, 2 }
 0x172   :  { %v2004_v0 = vsel %vm309_vm0, %v2323_v62, %v1996_v4  ;;  %v2017_v25 = vmul.f32 0.109360695, %v1955_v5  ;;  %v704_v35 = vsel %vm391_vm4, %v702_v61, %v703_v56  ;;  %v728_v50 = vrot.slane %v652_v55, 7 }
 0x173   :  { %v941_v44 = vadd.f32 %v2004_v0, %v1859_v59  ;;  %v953_v33 = vsel %vm327_vm1, %v2324_v22, %v952_v15  ;;  %v571_v52 = vadd.f32 %v1769_v14, %v1780_v13  ;;  %v713_v11 = vadd.f32 %v706_v20, %v692_v17 }
 0x174   :  { %v2023_v2 = vmul.f32 0.21300554, %v1955_v5  ;;  %v712_v34 = vadd.f32 %v704_v35, %v691_v49  ;;  %v717_v26 = vsel %vm405_vm5, %v715_v40, %v716_v30  ;;  %v2325_v39 = vrot.slane %v1861_v45, 3 }
 0x175   :  { %v958_v37 = vadd.f32 %v953_v33, %v941_v44  ;;  %v992_v22 = vrot.slane %v2007_v46, 4  ;;  %v1004_v21 = vmul.f32 0.26601174, %v291_v7  ;;  %v1005_v56 = vmul.f32 0.26601174, %v1955_v5 }
 0x176   :  { %v972_v62 = vsel %vm347_vm2, %v2325_v39, %v971_v3  ;;  %v725_v55 = vadd.f32 %v717_v26, %v712_v34  ;;  %v942_v14 = vadd.f32 %v1996_v4, %v2009_v23  ;;  %v2326_v13 = vrot.slane %v1682_v43, 7 }
 0x177   :  { %v2327_v20 = vrot.slane %v1709_v18, 7  ;;  %v2328_v30 = vrot.slane %v1503_v10, 7  ;;  %v973_v40 = vrot.slane %v2017_v25, 3  ;;  %v730_v7 = vsel %vm419_vm6, %v728_v50, %v729_v32 }
 0x178   :  { %v726_v44 = vadd.f32 %v719_v27, %v713_v11  ;;  %v2044_v33 = vmul.f32 0.0075987587, %v1955_v5  ;;  %v738_v35 = vadd.f32 %v730_v7, %v725_v55  ;;  %v979_v34 = vadd.f32 %v972_v62, %v958_v37 }
 0x179   :  { %v576_v61 = vsel %vm419_vm6, %v2327_v20, %v2326_v13  ;;  %v732_v17 = vsel %vm419_vm6, %v729_v32, %v2328_v30  ;;  %v994_v43 = vrot.slane %v2023_v2, 4  ;;  %v2329_v18 = vrot.slane %v1864_v54, 4 }
 0x17a   :  { %v584_v49 = vadd.f32 %v576_v61, %v571_v52  ;;  %v1013_v10 = vrot.slane %v1004_v21, 5  ;;  %v1015_v13 = vrot.slane %v1005_v56, 5  ;;  %v1028_v20 = vrot.slane %v2023_v2, 6 }
 0x17b   :  { %v993_v26 = vsel %vm369_vm3, %v2329_v18, %v992_v22  ;;  %v742_v32 = vadd.f32 %v738_v35, %v1902_v31  ;;  %v959_v27 = vadd.f32 %v952_v15, %v942_v14  ;;  %v1041_v50 = vrot.slane %v2017_v25, 7  ;;  %v2380_v25 = vld [vmem:[#allocation16_spill] sm:$0xff] }
 0x17c   :  { %v588_v39 = vadd.f32 %v584_v49, %v1680_v8  ;;  %v974_v52 = vsel %vm347_vm2, %v971_v3, %v973_v40  ;;  %v1026_v11 = vrot.slane %v2007_v46, 6  ;;  %v739_v62 = vadd.f32 %v732_v17, %v726_v44 }
 0x17d   :  { %v1000_v55 = vadd.f32 %v993_v26, %v979_v34  ;;  %v2059_v21 = vadd.f32 %v1974_v36, %v1761_v38  ;;  %v2330_v8 = vrot.slane %v1575_v19, 1  ;;  %v2331_v15 = vrot.slane %v1879_v16, 5  ;;  %v2342_v34 = vld [vmem:[#allocation36_spill] sm:$0xff] }
 0x17e   :  { %v597_v37 = vadd.f32 %v588_v39, %v1832_v1  ;;  %v751_v3 = vadd.f32 %v742_v32, %v1915_v12  ;;  %v2332_v1 = vrot.slane %v1819_v58, 1  ;;  %v980_v38 = vadd.f32 %v974_v52, %v959_v27  ;;  %v2345_v27 = vld [vmem:[#allocation26_spill] sm:$0xff] }
 0x17f   :  { %v440_v31 = vsel %vm309_vm0, %v1582_v29, %v2330_v8  ;;  %v1014_v2 = vsel %vm391_vm4, %v2331_v15, %v1013_v10  ;;  %v995_v36 = vsel %vm369_vm3, %v992_v22, %v994_v43  ;;  %v2333_v14 = vrot.slane %v1838_v53, 2  ;;  %v2347_v52 = vld [vmem:[#allocation22_spill] sm:$0xff] }
 0x180   :  { %v444_v46 = vadd.f32 %v440_v31, %v1715_v51  ;;  %v594_v56 = vsel %vm309_vm0, %v1821_v41, %v2332_v1  ;;  %v2334_v29 = vrot.slane %v1678_v47, 2  ;;  %v1016_v12 = vsel %vm391_vm4, %v1013_v10, %v1015_v13  ;;  %v2336_v41 = vld [vmem:[#allocation13_spill] sm:$0xff]  ;;  %v2349_v8 = vld [vmem:[#allocation18_spill] sm:$0xff] }
 0x181   :  { %v598_v61 = vadd.f32 %v594_v56, %v1964_v63  ;;  %v2335_v51 = vrot.slane %v1864_v54, 6  ;;  %v2337_v40 = vrot.slane %v2336_v41, 2  ;;  %v2338_v22 = vrot.slane %v1917_v28, 2  ;;  %v2339_v47 = vld [vmem:[#allocation21_spill] sm:$0xff] }
 0x182   :  { %v606_v16 = vsel %vm327_vm1, %v2334_v29, %v2333_v14  ;;  %v1021_v49 = vadd.f32 %v1014_v2, %v1000_v55  ;;  %v2340_v44 = vrot.slane %v2339_v47, 2  ;;  %v2341_v35 = vrot.slane %v1611_v42, 2  ;;  %v2357_v29 = vld [vmem:[#allocation29_spill] sm:$0xff] }
 0x183   :  { %v1027_v30 = vsel %vm405_vm5, %v2335_v51, %v1026_v11  ;;  %v2085_v17 = vadd.f32 %v606_v16, %v597_v37  ;;  %v760_v7 = vsel %vm327_vm1, %v2338_v22, %v2337_v40  ;;  %v2343_v43 = vrot.slane %v2342_v34, 2  ;;  %v2360_v22 = vld [vmem:[#allocation39_spill] sm:$0xff] }
 0x184   :  { %v454_v63 = vsel %vm327_vm1, %v2341_v35, %v2340_v44  ;;  %v2344_v54 = vmov %v2333_v14  ;;  %v743_v26 = vadd.f32 %v739_v62, %v1497_v6  ;;  %v1039_v10 = vrot.slane %v1992_v24, 7  ;;  %v2351_v24 = vld [vmem:[#allocation37_spill] sm:$0xff] }
 0x185   :  { %v608_v18 = vsel %vm327_vm1, %v2344_v54, %v2343_v43  ;;  %v766_v28 = vadd.f32 %v760_v7, %v751_v3  ;;  %v2104_v39 = vadd.f32 %v454_v63, %v444_v46  ;;  %v1001_v32 = vadd.f32 %v995_v36, %v980_v38  ;;  %v2353_v46 = vld [vmem:[#allocation15_spill] sm:$0xff]  ;;  %v2356_v38 = vld [vmem:[#allocation32_spill] sm:$0xff]  ;;  %v2361_v63 = vld [vmem:[#allocation25_spill] sm:$0xff] }
 0x186   :  { %v2106_v13 = vadd.f32 %v608_v18, %v598_v61  ;;  %v2346_v42 = vrot.slane %v2345_v27, 2  ;;  %v2348_v37 = vrot.slane %v2347_v52, 2  ;;  %v1033_v53 = vadd.f32 %v1951_v9, %v1980_v60  ;;  %v2362_v43 = vld [vmem:[#allocation24_spill] sm:$0xff]  ;;  %v2365_v52 = vld [vmem:[#allocation19_spill] sm:$0xff] }
 0x187   :  { %v752_v31 = vadd.f32 %v2349_v8, %v743_v26  ;;  %v2350_v6 = vrot.slane %v1861_v45, 7  ;;  %v2352_v62 = vrot.slane %v2351_v24, 7  ;;  %v1077_v2 = vmul.f32 %v2059_v21, %v2059_v21 }
 0x188   :  { %v914_v55 = vsel %vm327_vm1, %v2348_v37, %v2346_v42  ;;  %v1080_v3 = vmul.f32 %v2085_v17, %v2085_v17  ;;  %v2354_v1 = vrot.slane %v2353_v46, 2  ;;  %v2355_v56 = vmov %v2337_v40 }
 0x189   :  { %v1038_v15 = vsel %vm419_vm6, %v2352_v62, %v2350_v6  ;;  %v1034_v60 = vadd.f32 %v1027_v30, %v1021_v49  ;;  %v920_v36 = vadd.f32 %v914_v55, %v2356_v38  ;;  %v2358_v16 = vrot.slane %v2357_v29, 2 }
 0x18a   :  { %v762_v9 = vsel %vm327_vm1, %v2355_v56, %v2354_v1  ;;  %v2359_v61 = vmov %v2346_v42  ;;  %v1086_v40 = vsub.f32 %v766_v28, %v1077_v2  ;;  %v1078_v44 = vmul.f32 %v2104_v39, %v2104_v39  ;;  %v2363_v42 = vld [vmem:[#allocation17_spill] sm:$0xff]  ;;  %v2372_v56 = vld [vmem:[#allocation40_spill] sm:$0xff] }
 0x18b   :  { %v767_v14 = vadd.f32 %v762_v9, %v752_v31  ;;  %v916_v51 = vsel %vm327_vm1, %v2359_v61, %v2358_v16  ;;  %v1081_v41 = vmul.f32 %v2106_v13, %v2106_v13  ;;  %v1022_v35 = vadd.f32 %v1016_v12, %v1001_v32  ;;  %v2367_v31 = vld [vmem:[#allocation31_spill] sm:$0xff] }
 0x18c   :  { %v921_v7 = vadd.f32 %v916_v51, %v2360_v22  ;;  %v1029_v30 = vsel %vm405_vm5, %v1026_v11, %v1028_v20  ;;  %v1046_v49 = vadd.f32 %v1038_v15, %v1033_v53  ;;  %v418_v54 = vadd.f32 %v2362_v43, %v2361_v63  ;;  %v2369_v12 = vld [vmem:[#allocation35_spill] sm:$0xff]  ;;  %v2374_v22 = vld [vmem:[#allocation30_spill] sm:$0xff] }
 0x18d   :  { %v1089_v18 = vsub.f32 %v920_v36, %v1080_v3  ;;  %v1087_v26 = vsub.f32 %v767_v14, %v1078_v44  ;;  %v2364_v28 = vrot.slane %v2363_v42, 7  ;;  %v2366_v37 = vrot.slane %v2365_v52, 7  ;;  %v2373_v14 = vld [vmem:[#allocation20_spill] sm:$0xff]  ;;  %v2376_v63 = vld [vmem:[#allocation34_spill] sm:$0xff] }
 0x18e   :  { %v1090_v27 = vsub.f32 %v921_v7, %v1081_v41  ;;  %v1066_v8 = vrot.slane %v1859_v59, 2  ;;  %v2368_v6 = vrot.slane %v2367_v31, 6  ;;  %v2370_v32 = vrot.slane %v2369_v12, 6 }
 0x18f   :  { %v426_v55 = vsel %vm419_vm6, %v2366_v37, %v2364_v28  ;;  %v2371_v11 = vrot.slane %v1861_v45, 7  ;;  %v1062_v62 = vmul.f32 0.0010283802, %v1955_v5  ;;  %v1116_v1 = vadd.f32 %v1089_v18, %v1086_v40 }
 0x190   :  { %v567_v20 = vsel %vm405_vm5, %v2370_v32, %v2368_v6  ;;  %v432_v24 = vadd.f32 %v426_v55, %v418_v54  ;;  %v1055_v38 = vrot.slane %v2044_v33, 1  ;;  %v1035_v59 = vadd.f32 %v1029_v30, %v1022_v35  ;;  %v2379_v30 = vld [vmem:[#allocation23_spill] sm:$0xff]  ;;  %v2388_v32 = vld [vmem:[#allocation28_spill] sm:$0xff] }
 0x191   :  { %v1040_v53 = vsel %vm419_vm6, %v2371_v11, %v1039_v10  ;;  %v573_v9 = vadd.f32 %v567_v20, %v2372_v56  ;;  %v1042_v36 = vsel %vm419_vm6, %v1039_v10, %v1041_v50  ;;  %v1050_v45 = vadd.f32 %v1046_v49, %v1845_v57  ;;  %v2381_v50 = vld [vmem:[#allocation38_spill] sm:$0xff]  ;;  %v2382_v10 = vld [vmem:[#allocation27_spill] sm:$0xff] }
 0x192   :  { %v1047_v15 = vadd.f32 %v1040_v53, %v1034_v60  ;;  %v436_v16 = vadd.f32 %v2373_v14, %v432_v24  ;;  %v1110_v61 = vadd.f32 %v1080_v3, %v1077_v2  ;;  %v1117_v51 = vadd.f32 %v1090_v27, %v1087_v26 }
 0x193   :  { %v2375_v7 = vrot.slane %v2374_v22, 7  ;;  %v2377_v60 = vrot.slane %v2376_v63, 7  ;;  %v2378_v43 = vrot.slane %v1575_v19, 1  ;;  %v744_v54 = vadd.f32 %v2380_v25, %v2379_v30  ;;  %v2384_v19 = vld [vmem:[#allocation33_spill] sm:$0xff] }
 0x194   :  { %v898_v18 = vadd.f32 %v2382_v10, %v2381_v50  ;;  %v1049_v57 = vmul.f32 0.036000773, %v1955_v5  ;;  %v1051_v2 = vadd.f32 %v1047_v15, %v1990_v48  ;;  %v1119_v3 = vadd.f32 0.0009, %v1116_v1 }
 0x195   :  { %v580_v40 = vsel %vm419_vm6, %v2377_v60, %v2375_v7  ;;  %v445_v33 = vadd.f32 %v2378_v43, %v436_v16  ;;  %v1111_v49 = vadd.f32 %v1081_v41, %v1078_v44  ;;  %v1067_v26 = vrot.slane %v2009_v23, 2  ;;  %v2386_v44 = vld [vmem:[#allocation14_spill] sm:$0xff] }
 0x196   :  { %v586_v35 = vadd.f32 %v580_v40, %v573_v9  ;;  %v2383_v27 = vrot.slane %v2339_v47, 2  ;;  %v1048_v52 = vadd.f32 %v1042_v36, %v1035_v59  ;;  %v1069_v37 = vrot.slane %v1062_v62, 2 }
 0x197   :  { %v1059_v55 = vadd.f32 %v1050_v45, %v2004_v0  ;;  %v1113_v31 = vadd.f32 0.0001, %v1110_v61  ;;  %v1120_v6 = vadd.f32 0.0009, %v1117_v51  ;;  %v1056_v5 = vsel %vm309_vm0, %v1996_v4, %v1055_v38 }
 0x198   :  { %v460_v42 = vadd.f32 %v2383_v27, %v445_v33  ;;  %v590_v28 = vadd.f32 %v2384_v19, %v586_v35  ;;  %v2385_v48 = vrot.slane %v1819_v58, 1  ;;  %v2387_v41 = vrot.slane %v2386_v44, 1 }
 0x199   :  { %v2389_v47 = vrot.slane %v2388_v32, 1  ;;  %v1122_v11 = vmul.f32 %v1119_v3, %v1113_v31  ;;  %v1060_v53 = vadd.f32 %v1056_v5, %v1051_v2  ;;  %v1114_v24 = vadd.f32 0.0001, %v1111_v49  ;;  %v1137_v49 = vpop.permute.xlu0 %1136 }
 0x19a   :  { %v599_v12 = vadd.f32 %v2385_v48, %v590_v28  ;;  %v753_v23 = vadd.f32 %v2387_v41, %v744_v54  ;;  %v1068_v62 = vsel %vm327_vm1, %v1066_v8, %v1067_v26  ;;  %v2390_v0 = vrot.slane %v2342_v34, 2  ;;  %v1147_v48 = vpop.permute.xlu1 %1146 }
 0x19b   :  { %v907_v20 = vadd.f32 %v2389_v47, %v898_v18  ;;  %v1052_v1 = vadd.f32 %v1049_v57, %v1048_v52  ;;  %v1079_v56 = vmul.f32 %v460_v42, %v460_v42  ;;  %v1074_v4 = vadd.f32 %v1068_v62, %v1059_v55 }
 0x19c   :  { %v614_v15 = vadd.f32 %v2390_v0, %v599_v12  ;;  %v1123_v9 = vmul.f32 %v1120_v6, %v1114_v24  ;;  %v1070_v58 = vsel %vm327_vm1, %v1067_v26, %v1069_v37  ;;  %v2391_v59 = vrot.slane %v2353_v46, 2 }
 0x19d   :  { %v2392_v14 = vrot.slane %v2357_v29, 2  ;;  %v1083_v61 = vmul.f32 %v2085_v17, %v2059_v21  ;;  %1324 = vrcp.f32 %v1122_v11  ;;  %v1075_v8 = vadd.f32 %v1070_v58, %v1060_v53  ;;  %v1142_v55 = vpop.permute.xlu0 %1141 }
 0x19e   :  { %v768_v36 = vadd.f32 %v2391_v59, %v753_v23  ;;  %v1082_v45 = vmul.f32 %v614_v15, %v614_v15  ;;  %v1061_v34 = vadd.f32 %v1055_v38, %v1052_v1  ;;  %v1084_v60 = vmul.f32 %v2106_v13, %v2104_v39 }
 0x19f   :  { %v922_v16 = vadd.f32 %v2392_v14, %v907_v20  ;;  %v1092_v63 = vsub.f32 %v1074_v4, %v1083_v61  ;;  %1326 = vrcp.f32 %v1123_v9  ;;  %v1085_v30 = vmul.f32 %v614_v15, %v460_v42 }
 0x1a0   :  { %v1088_v51 = vsub.f32 %v768_v36, %v1079_v56  ;;  %v1112_v7 = vadd.f32 %v1082_v45, %v1079_v56  ;;  %v1093_v40 = vsub.f32 %v1075_v8, %v1084_v60  ;;  %v1076_v43 = vadd.f32 %v1069_v37, %v1061_v34 }
 0x1a1   :  { %v1091_v22 = vsub.f32 %v922_v16, %v1082_v45  ;;  %v1101_v35 = vmul.f32 2.0, %v1092_v63  ;;  %v1095_v21 = vmul.f32 2.0, %v1083_v61  ;;  %v1096_v50 = vmul.f32 2.0, %v1084_v60 }
 0x1a2   :  { %v1115_v29 = vadd.f32 0.0001, %v1112_v7  ;;  %v1102_v17 = vmul.f32 2.0, %v1093_v40  ;;  %v1094_v54 = vsub.f32 %v1076_v43, %v1085_v30  ;;  %v1097_v26 = vmul.f32 2.0, %v1085_v30 }
 0x1a3   :  { %v1118_v46 = vadd.f32 %v1091_v22, %v1088_v51  ;;  %v1104_v38 = vadd.f32 0.0009, %v1101_v35  ;;  %v1098_v10 = vadd.f32 0.0001, %v1095_v21  ;;  %v1099_v13 = vadd.f32 0.0001, %v1096_v50 }
 0x1a4   :  { %v1105_v18 = vadd.f32 0.0009, %v1102_v17  ;;  %v1103_v2 = vmul.f32 2.0, %v1094_v54  ;;  %v1100_v52 = vadd.f32 0.0001, %v1097_v26 }
 0x1a5   :  { %v1121_v33 = vadd.f32 0.0009, %v1118_v46  ;;  %v1107_v39 = vmul.f32 %v1104_v38, %v1098_v10 }
 0x1a6   :  { %v1108_v19 = vmul.f32 %v1105_v18, %v1099_v13  ;;  %v1106_v28 = vadd.f32 0.0009, %v1103_v2 }
 0x1a7   :  { %v1124_v25 = vmul.f32 %v1121_v33, %v1115_v29 }
 0x1a8   :  { %v1109_v31 = vmul.f32 %v1106_v28, %v1100_v52 }
 0x1a9   :  { %1328 = vrcp.f32 %v1124_v25 }
 0x1aa   :  { %v1325_v57 = vpop.eup %1324 }
 0x1ab   :  { %v1126_v27 = vmul.f32 %v1325_v57, %v1107_v39 }
 0x1ac   :  { %v1327_v3 = vpop.eup %1326 }
 0x1ad   :  { %v1128_v42 = vmul.f32 %v1327_v3, %v1108_v19  ;;  %v1149_v37 = vmul.f32 %v1137_v49, %v1126_v27 }
 0x1af   :  { %v1150_v5 = vmul.f32 %v1142_v55, %v1128_v42 }
 0x1b1   :  { %v1152_v44 = vadd.f32 %v1150_v5, %v1149_v37 }
 0x1b6   :  { %v1329_v6 = vpop.eup %1328 }
 0x1b7   :  { %v1130_v12 = vmul.f32 %v1329_v6, %v1109_v31 }
 0x1b9   :  { %v1151_v41 = vmul.f32 %v1147_v48, %v1130_v12 }
 0x1bb   :  { %v1153_v23 = vsel %vm327_vm1, %v1151_v41, 0.0 }
 0x1bc   :  { %v1154_v32 = vadd.f32 %v1153_v23, %v1152_v44 }
 0x1be   :  { %1155 = vadd.xlane.f32.xlu1 %v1154_v32 }
 0x247   :  { %v1156_v47 = vpop.xlane.xlu1 %1155 }
 0x248   :  { %v1157_v20 = vrot.slane %v1156_v47, 4 }
 0x24a   :  { %v1158_v11 = vadd.f32 %v1157_v20, %v1156_v47 }
 0x24c   :  { %v1159_v53 = vrot.slane %v1158_v11, 2 }
 0x24e   :  { %v1160_v24 = vadd.f32 %v1159_v53, %v1158_v11 }
 0x250   :  { %v1161_v62 = vrot.slane %v1160_v24, 1 }
 0x252   :  { %v1162_v0 = vadd.f32 %v1161_v62, %v1160_v24 }
 0x254   :  { %1313 = vpush %v1162_v0 }
 0x285   :  { %s1314_s10 = spop %1313 }
 0x286   :  { %v1164_v15 = vstv %s1314_s10 }
 0x287   :  { %1166 = vst.msk [vmem:[#allocation9] sm:$0x1] %vm1165_vm7, %v1164_v15 }
 0x288   :  { %1401 = shalt.err (!%p1398_p5)
}
 0x289   :  { %1176 = dma.vmem_to_hbm [thread:$0]  %s1174_s9, 16, %s2212_s4, [#allocation5]  }
 0x28a   :  { %1414 = dma.done.wait [#allocation5], 16  }
 0x28b   :  { %1415 = vsyncadd [#allocation5], 4294967280 }
 0x28c   :  { %1180 = vsyncpa [#allocation4], 1 }
 0x28d   :  { %1181 = vsyncpa [#allocation7], 1 }
 0x28e   :  { %1182 = vsyncpa [#allocation5], 1 }

</bundles_post_ra>
